<compile_context>
chip_gen: v7x
topology: tpu7x:2x2x1
jax: 0.10.0
libtpu: 0.0.40
codegen_flags: <defaults>
</compile_context>

<pallas_src>
import math

import jax
import jax.numpy as jnp
from jax import lax
from jax.experimental import pallas as pl
from jax.experimental.pallas import tpu as pltpu  # noqa: F401  (kept for TPU-specific params)

# ------------------------ small synthetic BERT config ------------------------
BATCH = 2
SEQ = 8
HIDDEN = 32
INTERMEDIATE = 64
NUM_HEADS = 4
HEAD_DIM = HIDDEN // NUM_HEADS
NUM_LAYERS = 2
VOCAB = 100
MAX_POS = 16
TYPE_VOCAB = 2
LN_EPS = 1e-12
INIT_RANGE = 0.02

MM_DTYPE = jnp.bfloat16  # matmul-operand dtype (accumulation stays f32)


# ------------------------------- kernel helpers -------------------------------
def _linear(x, w, b):
    # x: (L, in) f32, w: (out, in) bf16, b: (1, out) f32  ->  (L, out) f32
    y = lax.dot_general(x.astype(w.dtype), w, (((1,), (1,)), ((), ())),
                        preferred_element_type=jnp.float32)
    return y + b


def _layer_norm(x, gamma, beta):
    u = jnp.mean(x, axis=-1, keepdims=True)
    xc = x - u
    var = jnp.mean(xc * xc, axis=-1, keepdims=True)
    return xc * lax.rsqrt(var + LN_EPS) * gamma + beta


def _gelu(x):
    # TODO(synk): tanh-approximate gelu; original BERT uses the erf-based gelu (~1e-3 diff).
    return 0.5 * x * (1.0 + jnp.tanh(0.7978845608028654 * (x + 0.044715 * x * x * x)))


def _stack_heads(t):
    # (B*S, H) -> (B*NUM_HEADS, S, HEAD_DIM)  via static sublane/lane slices + leading-dim stack
    return jnp.stack(
        [t[b * SEQ:(b + 1) * SEQ, h * HEAD_DIM:(h + 1) * HEAD_DIM]
         for b in range(BATCH) for h in range(NUM_HEADS)], axis=0)


def _merge_heads(ctx):
    # (B*NUM_HEADS, S, HEAD_DIM) -> (B*S, H)  via lane-concat of heads, sublane-concat of batches
    rows = []
    for b in range(BATCH):
        rows.append(jnp.concatenate(
            [ctx[b * NUM_HEADS + h] for h in range(NUM_HEADS)], axis=-1))
    return jnp.concatenate(rows, axis=0)


# ------------------------------- fused Pallas kernel -------------------------------
def _bert_forward_kernel(x_ref, mb_ref, eg_ref, eb_ref,
                         wqkv_ref, bqkv_ref, wo_ref, bo_ref,
                         g1_ref, b1_ref, wi_ref, bi_ref,
                         w2_ref, b2_ref, g2_ref, b2n_ref,
                         qaw_ref, qab_ref,
                         start_ref, end_ref):
    # Embedding LayerNorm on the whole (B*S, H) block.
    x = _layer_norm(x_ref[...], eg_ref[...], eb_ref[...])          # (B*S, H) f32

    # Additive attention-mask bias, broadcast once over heads & queries: (B*NH, 1, S).
    mb = mb_ref[...]                                                # (B, S)
    mb_stack = jnp.stack([mb[b:b + 1, :] for b in range(BATCH)
                          for _ in range(NUM_HEADS)], axis=0)       # (B*NH, 1, S)

    scale = 1.0 / math.sqrt(HEAD_DIM)

    for l in range(NUM_LAYERS):
        # Fused QKV projection: one (B*S, H) x (H, 3H) matmul.
        qkv = _linear(x, wqkv_ref[l], bqkv_ref[l])                  # (B*S, 3H) f32
        q = qkv[:, :HIDDEN]
        k = qkv[:, HIDDEN:2 * HIDDEN]
        v = qkv[:, 2 * HIDDEN:]

        qs = _stack_heads(q).astype(MM_DTYPE)                       # (B*NH, S, HD)
        ks = _stack_heads(k).astype(MM_DTYPE)
        vs = _stack_heads(v).astype(MM_DTYPE)

        # All heads' scores / softmax / contexts in one batched pass.
        sc = jnp.einsum('gqd,gkd->gqk', qs, ks,
                        preferred_element_type=jnp.float32) * scale + mb_stack
        sc = sc - jnp.max(sc, axis=-1, keepdims=True)
        p = jnp.exp(sc)
        p = p * pl.reciprocal(jnp.sum(p, axis=-1, keepdims=True), approx=True)
        ctx = jnp.einsum('gqk,gkd->gqd', p.astype(MM_DTYPE), vs,
                         preferred_element_type=jnp.float32)        # (B*NH, S, HD) f32

        # Output projection: single (B*S, H) x (H, H) matmul.
        attn = _linear(_merge_heads(ctx), wo_ref[l], bo_ref[l])

        x1 = _layer_norm(x + attn, g1_ref[l], b1_ref[l])
        inter = _gelu(_linear(x1, wi_ref[l], bi_ref[l]))
        ffn = _linear(inter, w2_ref[l], b2_ref[l])
        x = _layer_norm(x1 + ffn, g2_ref[l], b2n_ref[l])

    # qa_outputs head, fused: lane-dense (2, B*S) logits, split along sublanes.
    se = lax.dot_general(qaw_ref[...], x.astype(MM_DTYPE),
                         (((1,), (1,)), ((), ())),
                         preferred_element_type=jnp.float32) + qab_ref[...]   # (2, B*S)
    start_ref[...] = se[0:1, :]
    end_ref[...] = se[1:2, :]


def bert_forward_fused(x2d, mask_bias, p):
    out_shape = (jax.ShapeDtypeStruct((1, BATCH * SEQ), jnp.float32),
                 jax.ShapeDtypeStruct((1, BATCH * SEQ), jnp.float32))
    # No grid: a single kernel invocation with every operand fully resident in VMEM.
    return pl.pallas_call(
        _bert_forward_kernel,
        out_shape=out_shape,
    )(x2d, mask_bias,
      p["emb_ln_g"], p["emb_ln_b"],
      p["wqkv"], p["bqkv"], p["wo"], p["bo"],
      p["ln1_g"], p["ln1_b"], p["wi"], p["bi"],
      p["w2"], p["b2"], p["ln2_g"], p["ln2_b"],
      p["qa_w"], p["qa_b"])


# ------------------------------- parameters -------------------------------
def init_params(key):
    keys = iter(jax.random.split(key, 64))

    def nrm(shape, dtype=jnp.float32):
        return (INIT_RANGE * jax.random.normal(next(keys), shape, jnp.float32)).astype(dtype)

    def zeros(shape):
        return jnp.zeros(shape, jnp.float32)

    L = NUM_LAYERS
    return {
        "word_emb": nrm((VOCAB, HIDDEN)),
        "pos_emb": nrm((MAX_POS, HIDDEN)),
        "type_emb": nrm((TYPE_VOCAB, HIDDEN)),
        "emb_ln_g": nrm((1, HIDDEN)),
        "emb_ln_b": nrm((1, HIDDEN)),
        # Per-layer weights stacked on a leading NUM_LAYERS axis (kernel loops internally).
        "wqkv": nrm((L, 3 * HIDDEN, HIDDEN), MM_DTYPE),   # [Wq; Wk; Wv], PyTorch (out, in)
        "bqkv": zeros((L, 1, 3 * HIDDEN)),
        "wo": nrm((L, HIDDEN, HIDDEN), MM_DTYPE),
        "bo": zeros((L, 1, HIDDEN)),
        "ln1_g": nrm((L, 1, HIDDEN)),
        "ln1_b": nrm((L, 1, HIDDEN)),
        "wi": nrm((L, INTERMEDIATE, HIDDEN), MM_DTYPE),
        "bi": zeros((L, 1, INTERMEDIATE)),
        "w2": nrm((L, HIDDEN, INTERMEDIATE), MM_DTYPE),
        "b2": zeros((L, 1, HIDDEN)),
        "ln2_g": nrm((L, 1, HIDDEN)),
        "ln2_b": nrm((L, 1, HIDDEN)),
        "qa_w": nrm((2, HIDDEN), MM_DTYPE),
        "qa_b": zeros((2, 1)),
    }


# ------------------------------- forward pass -------------------------------
def forward(params, input_ids, token_type_ids, attention_mask):
    # Embedding lookup (gather) is plain-JAX glue.
    pos_ids = jnp.arange(SEQ)
    emb = (params["word_emb"][input_ids]
           + params["pos_emb"][pos_ids][None, :, :]
           + params["type_emb"][token_type_ids])
    x2d = emb.reshape(BATCH * SEQ, HIDDEN)

    # extended attention mask: (1 - mask) * -10000, per key position.
    mask_bias = (1.0 - attention_mask.astype(jnp.float32)) * -10000.0   # (B, SEQ)

    start2d, end2d = bert_forward_fused(x2d, mask_bias, params)
    return start2d.reshape(BATCH, SEQ), end2d.reshape(BATCH, SEQ)


# ------------------------------- demo -------------------------------
if __name__ == "__main__":
    key = jax.random.PRNGKey(0)
    k_ids, k_types, k_params = jax.random.split(key, 3)

    input_ids = jax.random.randint(k_ids, (BATCH, SEQ), 0, VOCAB, dtype=jnp.int32)
    token_type_ids = jax.random.randint(k_types, (BATCH, SEQ), 0, TYPE_VOCAB, dtype=jnp.int32)
    attention_mask = jnp.array([[1] * SEQ, [1] * (SEQ - 2) + [0] * 2], dtype=jnp.int32)

    params = init_params(k_params)

    start_logits, end_logits = jax.jit(forward)(params, input_ids, token_type_ids,
                                                attention_mask)
    jax.block_until_ready((start_logits, end_logits))

    assert start_logits.shape == (BATCH, SEQ) and end_logits.shape == (BATCH, SEQ)
    assert bool(jnp.all(jnp.isfinite(start_logits)))
    assert bool(jnp.all(jnp.isfinite(end_logits)))
    print("KERNEL_OK")
</pallas_src>

<mosaic_0001>
module attributes {stable_mosaic.version = 11 : i64} {
  func.func @_bert_forward_kernel(%arg0: memref<16x32xf32, #tpu.memory_space<vmem>>, %arg1: memref<2x8xf32, #tpu.memory_space<vmem>>, %arg2: memref<1x32xf32, #tpu.memory_space<vmem>>, %arg3: memref<1x32xf32, #tpu.memory_space<vmem>>, %arg4: memref<2x96x32xbf16, #tpu.memory_space<vmem>>, %arg5: memref<2x1x96xf32, #tpu.memory_space<vmem>>, %arg6: memref<2x32x32xbf16, #tpu.memory_space<vmem>>, %arg7: memref<2x1x32xf32, #tpu.memory_space<vmem>>, %arg8: memref<2x1x32xf32, #tpu.memory_space<vmem>>, %arg9: memref<2x1x32xf32, #tpu.memory_space<vmem>>, %arg10: memref<2x64x32xbf16, #tpu.memory_space<vmem>>, %arg11: memref<2x1x64xf32, #tpu.memory_space<vmem>>, %arg12: memref<2x32x64xbf16, #tpu.memory_space<vmem>>, %arg13: memref<2x1x32xf32, #tpu.memory_space<vmem>>, %arg14: memref<2x1x32xf32, #tpu.memory_space<vmem>>, %arg15: memref<2x1x32xf32, #tpu.memory_space<vmem>>, %arg16: memref<2x32xbf16, #tpu.memory_space<vmem>>, %arg17: memref<2x1xf32, #tpu.memory_space<vmem>>, %arg18: memref<1x16xf32, #tpu.memory_space<vmem>>, %arg19: memref<1x16xf32, #tpu.memory_space<vmem>>) attributes {dimension_semantics = [], scalar_prefetch = 0 : i64, scratch_operands = 0 : i64, tpu.core_type = #tpu.core_type<tc>} {
    %c0 = arith.constant 0 : index
    %c0_0 = arith.constant 0 : index
    %0 = vector.load %arg0[%c0, %c0_0] : memref<16x32xf32, #tpu.memory_space<vmem>>, vector<16x32xf32>
    %c0_1 = arith.constant 0 : index
    %c0_2 = arith.constant 0 : index
    %1 = vector.load %arg2[%c0_1, %c0_2] : memref<1x32xf32, #tpu.memory_space<vmem>>, vector<1x32xf32>
    %c0_3 = arith.constant 0 : index
    %c0_4 = arith.constant 0 : index
    %2 = vector.load %arg3[%c0_3, %c0_4] : memref<1x32xf32, #tpu.memory_space<vmem>>, vector<1x32xf32>
    %cst = arith.constant dense<0.000000e+00> : vector<16xf32>
    %3 = vector.multi_reduction <add>, %0, %cst [1] : vector<16x32xf32> to vector<16xf32>
    %4 = vector.shape_cast %3 : vector<16xf32> to vector<16x1xf32>
    %cst_5 = arith.constant 3.200000e+01 : f32
    %5 = vector.broadcast %cst_5 : f32 to vector<16x1xf32>
    %6 = arith.divf %4, %5 : vector<16x1xf32>
    %7 = vector.broadcast %6 : vector<16x1xf32> to vector<16x32xf32>
    %8 = arith.subf %0, %7 : vector<16x32xf32>
    %9 = arith.mulf %8, %8 : vector<16x32xf32>
    %cst_6 = arith.constant dense<0.000000e+00> : vector<16xf32>
    %10 = vector.multi_reduction <add>, %9, %cst_6 [1] : vector<16x32xf32> to vector<16xf32>
    %11 = vector.shape_cast %10 : vector<16xf32> to vector<16x1xf32>
    %cst_7 = arith.constant 3.200000e+01 : f32
    %12 = vector.broadcast %cst_7 : f32 to vector<16x1xf32>
    %13 = arith.divf %11, %12 : vector<16x1xf32>
    %cst_8 = arith.constant 9.99999996E-13 : f32
    %14 = vector.broadcast %cst_8 : f32 to vector<16x1xf32>
    %15 = arith.addf %13, %14 : vector<16x1xf32>
    %16 = math.rsqrt %15 : vector<16x1xf32>
    %17 = vector.broadcast %16 : vector<16x1xf32> to vector<16x32xf32>
    %18 = arith.mulf %8, %17 : vector<16x32xf32>
    %19 = vector.broadcast %1 : vector<1x32xf32> to vector<16x32xf32>
    %20 = arith.mulf %18, %19 : vector<16x32xf32>
    %21 = vector.broadcast %2 : vector<1x32xf32> to vector<16x32xf32>
    %22 = arith.addf %20, %21 : vector<16x32xf32>
    %c0_9 = arith.constant 0 : index
    %c0_10 = arith.constant 0 : index
    %23 = vector.load %arg1[%c0_9, %c0_10] : memref<2x8xf32, #tpu.memory_space<vmem>>, vector<2x8xf32>
    %24 = vector.extract_strided_slice %23 {offsets = [0, 0], sizes = [1, 8], strides = [1, 1]} : vector<2x8xf32> to vector<1x8xf32>
    %25 = vector.extract_strided_slice %23 {offsets = [0, 0], sizes = [1, 8], strides = [1, 1]} : vector<2x8xf32> to vector<1x8xf32>
    %26 = vector.extract_strided_slice %23 {offsets = [0, 0], sizes = [1, 8], strides = [1, 1]} : vector<2x8xf32> to vector<1x8xf32>
    %27 = vector.extract_strided_slice %23 {offsets = [0, 0], sizes = [1, 8], strides = [1, 1]} : vector<2x8xf32> to vector<1x8xf32>
    %28 = vector.extract_strided_slice %23 {offsets = [1, 0], sizes = [1, 8], strides = [1, 1]} : vector<2x8xf32> to vector<1x8xf32>
    %29 = vector.extract_strided_slice %23 {offsets = [1, 0], sizes = [1, 8], strides = [1, 1]} : vector<2x8xf32> to vector<1x8xf32>
    %30 = vector.extract_strided_slice %23 {offsets = [1, 0], sizes = [1, 8], strides = [1, 1]} : vector<2x8xf32> to vector<1x8xf32>
    %31 = vector.extract_strided_slice %23 {offsets = [1, 0], sizes = [1, 8], strides = [1, 1]} : vector<2x8xf32> to vector<1x8xf32>
    %32 = vector.shape_cast %24 : vector<1x8xf32> to vector<1x1x8xf32>
    %33 = vector.shape_cast %25 : vector<1x8xf32> to vector<1x1x8xf32>
    %34 = vector.shape_cast %26 : vector<1x8xf32> to vector<1x1x8xf32>
    %35 = vector.shape_cast %27 : vector<1x8xf32> to vector<1x1x8xf32>
    %36 = vector.shape_cast %28 : vector<1x8xf32> to vector<1x1x8xf32>
    %37 = vector.shape_cast %29 : vector<1x8xf32> to vector<1x1x8xf32>
    %38 = vector.shape_cast %30 : vector<1x8xf32> to vector<1x1x8xf32>
    %39 = vector.shape_cast %31 : vector<1x8xf32> to vector<1x1x8xf32>
    %40 = tpu.concatenate %32, %33, %34, %35, %36, %37, %38, %39 in 0 : vector<1x1x8xf32>, vector<1x1x8xf32>, vector<1x1x8xf32>, vector<1x1x8xf32>, vector<1x1x8xf32>, vector<1x1x8xf32>, vector<1x1x8xf32>, vector<1x1x8xf32> -> vector<8x1x8xf32>
    %c0_11 = arith.constant 0 : index
    %c0_12 = arith.constant 0 : index
    %c0_13 = arith.constant 0 : index
    %41 = vector.load %arg4[%c0_11, %c0_12, %c0_13] : memref<2x96x32xbf16, #tpu.memory_space<vmem>>, vector<1x96x32xbf16>
    %42 = vector.shape_cast %41 : vector<1x96x32xbf16> to vector<96x32xbf16>
    %c0_14 = arith.constant 0 : index
    %c0_15 = arith.constant 0 : index
    %c0_16 = arith.constant 0 : index
    %43 = vector.load %arg5[%c0_14, %c0_15, %c0_16] : memref<2x1x96xf32, #tpu.memory_space<vmem>>, vector<1x1x96xf32>
    %44 = vector.shape_cast %43 : vector<1x1x96xf32> to vector<1x96xf32>
    %45 = arith.truncf %22 : vector<16x32xf32> to vector<16x32xbf16>
    %cst_17 = arith.constant dense<0.000000e+00> : vector<16x96xf32>
    %46 = tpu.matmul %45, %42, %cst_17 {dimension_numbers = #tpu.dot_dimension_numbers<[1], [1], [0], [0], [0, 0, 1, 0], [], []>} : vector<16x32xbf16>, vector<96x32xbf16>, vector<16x96xf32> -> vector<16x96xf32>
    %47 = vector.broadcast %44 : vector<1x96xf32> to vector<16x96xf32>
    %48 = arith.addf %46, %47 : vector<16x96xf32>
    %49 = vector.extract_strided_slice %48 {offsets = [0, 0], sizes = [16, 32], strides = [1, 1]} : vector<16x96xf32> to vector<16x32xf32>
    %50 = vector.extract_strided_slice %48 {offsets = [0, 32], sizes = [16, 32], strides = [1, 1]} : vector<16x96xf32> to vector<16x32xf32>
    %51 = vector.extract_strided_slice %48 {offsets = [0, 64], sizes = [16, 32], strides = [1, 1]} : vector<16x96xf32> to vector<16x32xf32>
    %52 = vector.extract_strided_slice %49 {offsets = [0, 0], sizes = [8, 8], strides = [1, 1]} : vector<16x32xf32> to vector<8x8xf32>
    %53 = vector.extract_strided_slice %49 {offsets = [0, 8], sizes = [8, 8], strides = [1, 1]} : vector<16x32xf32> to vector<8x8xf32>
    %54 = vector.extract_strided_slice %49 {offsets = [0, 16], sizes = [8, 8], strides = [1, 1]} : vector<16x32xf32> to vector<8x8xf32>
    %55 = vector.extract_strided_slice %49 {offsets = [0, 24], sizes = [8, 8], strides = [1, 1]} : vector<16x32xf32> to vector<8x8xf32>
    %56 = vector.extract_strided_slice %49 {offsets = [8, 0], sizes = [8, 8], strides = [1, 1]} : vector<16x32xf32> to vector<8x8xf32>
    %57 = vector.extract_strided_slice %49 {offsets = [8, 8], sizes = [8, 8], strides = [1, 1]} : vector<16x32xf32> to vector<8x8xf32>
    %58 = vector.extract_strided_slice %49 {offsets = [8, 16], sizes = [8, 8], strides = [1, 1]} : vector<16x32xf32> to vector<8x8xf32>
    %59 = vector.extract_strided_slice %49 {offsets = [8, 24], sizes = [8, 8], strides = [1, 1]} : vector<16x32xf32> to vector<8x8xf32>
    %60 = vector.shape_cast %52 : vector<8x8xf32> to vector<1x8x8xf32>
    %61 = vector.shape_cast %53 : vector<8x8xf32> to vector<1x8x8xf32>
    %62 = vector.shape_cast %54 : vector<8x8xf32> to vector<1x8x8xf32>
    %63 = vector.shape_cast %55 : vector<8x8xf32> to vector<1x8x8xf32>
    %64 = vector.shape_cast %56 : vector<8x8xf32> to vector<1x8x8xf32>
    %65 = vector.shape_cast %57 : vector<8x8xf32> to vector<1x8x8xf32>
    %66 = vector.shape_cast %58 : vector<8x8xf32> to vector<1x8x8xf32>
    %67 = vector.shape_cast %59 : vector<8x8xf32> to vector<1x8x8xf32>
    %68 = tpu.concatenate %60, %61, %62, %63, %64, %65, %66, %67 in 0 : vector<1x8x8xf32>, vector<1x8x8xf32>, vector<1x8x8xf32>, vector<1x8x8xf32>, vector<1x8x8xf32>, vector<1x8x8xf32>, vector<1x8x8xf32>, vector<1x8x8xf32> -> vector<8x8x8xf32>
    %69 = arith.truncf %68 : vector<8x8x8xf32> to vector<8x8x8xbf16>
    %70 = vector.extract_strided_slice %50 {offsets = [0, 0], sizes = [8, 8], strides = [1, 1]} : vector<16x32xf32> to vector<8x8xf32>
    %71 = vector.extract_strided_slice %50 {offsets = [0, 8], sizes = [8, 8], strides = [1, 1]} : vector<16x32xf32> to vector<8x8xf32>
    %72 = vector.extract_strided_slice %50 {offsets = [0, 16], sizes = [8, 8], strides = [1, 1]} : vector<16x32xf32> to vector<8x8xf32>
    %73 = vector.extract_strided_slice %50 {offsets = [0, 24], sizes = [8, 8], strides = [1, 1]} : vector<16x32xf32> to vector<8x8xf32>
    %74 = vector.extract_strided_slice %50 {offsets = [8, 0], sizes = [8, 8], strides = [1, 1]} : vector<16x32xf32> to vector<8x8xf32>
    %75 = vector.extract_strided_slice %50 {offsets = [8, 8], sizes = [8, 8], strides = [1, 1]} : vector<16x32xf32> to vector<8x8xf32>
    %76 = vector.extract_strided_slice %50 {offsets = [8, 16], sizes = [8, 8], strides = [1, 1]} : vector<16x32xf32> to vector<8x8xf32>
    %77 = vector.extract_strided_slice %50 {offsets = [8, 24], sizes = [8, 8], strides = [1, 1]} : vector<16x32xf32> to vector<8x8xf32>
    %78 = vector.shape_cast %70 : vector<8x8xf32> to vector<1x8x8xf32>
    %79 = vector.shape_cast %71 : vector<8x8xf32> to vector<1x8x8xf32>
    %80 = vector.shape_cast %72 : vector<8x8xf32> to vector<1x8x8xf32>
    %81 = vector.shape_cast %73 : vector<8x8xf32> to vector<1x8x8xf32>
    %82 = vector.shape_cast %74 : vector<8x8xf32> to vector<1x8x8xf32>
    %83 = vector.shape_cast %75 : vector<8x8xf32> to vector<1x8x8xf32>
    %84 = vector.shape_cast %76 : vector<8x8xf32> to vector<1x8x8xf32>
    %85 = vector.shape_cast %77 : vector<8x8xf32> to vector<1x8x8xf32>
    %86 = tpu.concatenate %78, %79, %80, %81, %82, %83, %84, %85 in 0 : vector<1x8x8xf32>, vector<1x8x8xf32>, vector<1x8x8xf32>, vector<1x8x8xf32>, vector<1x8x8xf32>, vector<1x8x8xf32>, vector<1x8x8xf32>, vector<1x8x8xf32> -> vector<8x8x8xf32>
    %87 = arith.truncf %86 : vector<8x8x8xf32> to vector<8x8x8xbf16>
    %88 = vector.extract_strided_slice %51 {offsets = [0, 0], sizes = [8, 8], strides = [1, 1]} : vector<16x32xf32> to vector<8x8xf32>
    %89 = vector.extract_strided_slice %51 {offsets = [0, 8], sizes = [8, 8], strides = [1, 1]} : vector<16x32xf32> to vector<8x8xf32>
    %90 = vector.extract_strided_slice %51 {offsets = [0, 16], sizes = [8, 8], strides = [1, 1]} : vector<16x32xf32> to vector<8x8xf32>
    %91 = vector.extract_strided_slice %51 {offsets = [0, 24], sizes = [8, 8], strides = [1, 1]} : vector<16x32xf32> to vector<8x8xf32>
    %92 = vector.extract_strided_slice %51 {offsets = [8, 0], sizes = [8, 8], strides = [1, 1]} : vector<16x32xf32> to vector<8x8xf32>
    %93 = vector.extract_strided_slice %51 {offsets = [8, 8], sizes = [8, 8], strides = [1, 1]} : vector<16x32xf32> to vector<8x8xf32>
    %94 = vector.extract_strided_slice %51 {offsets = [8, 16], sizes = [8, 8], strides = [1, 1]} : vector<16x32xf32> to vector<8x8xf32>
    %95 = vector.extract_strided_slice %51 {offsets = [8, 24], sizes = [8, 8], strides = [1, 1]} : vector<16x32xf32> to vector<8x8xf32>
    %96 = vector.shape_cast %88 : vector<8x8xf32> to vector<1x8x8xf32>
    %97 = vector.shape_cast %89 : vector<8x8xf32> to vector<1x8x8xf32>
    %98 = vector.shape_cast %90 : vector<8x8xf32> to vector<1x8x8xf32>
    %99 = vector.shape_cast %91 : vector<8x8xf32> to vector<1x8x8xf32>
    %100 = vector.shape_cast %92 : vector<8x8xf32> to vector<1x8x8xf32>
    %101 = vector.shape_cast %93 : vector<8x8xf32> to vector<1x8x8xf32>
    %102 = vector.shape_cast %94 : vector<8x8xf32> to vector<1x8x8xf32>
    %103 = vector.shape_cast %95 : vector<8x8xf32> to vector<1x8x8xf32>
    %104 = tpu.concatenate %96, %97, %98, %99, %100, %101, %102, %103 in 0 : vector<1x8x8xf32>, vector<1x8x8xf32>, vector<1x8x8xf32>, vector<1x8x8xf32>, vector<1x8x8xf32>, vector<1x8x8xf32>, vector<1x8x8xf32>, vector<1x8x8xf32> -> vector<8x8x8xf32>
    %105 = arith.truncf %104 : vector<8x8x8xf32> to vector<8x8x8xbf16>
    "tpu.trace_start"() <{level = 10 : i32, message = "gqd,gkd->gqk"}> : () -> ()
    %cst_18 = arith.constant dense<0.000000e+00> : vector<8x8x8xf32>
    %106 = tpu.matmul %69, %87, %cst_18 {dimension_numbers = #tpu.dot_dimension_numbers<[2], [2], [1], [1], [0, 0, 0, 1, 1, 1], [0], [0]>} : vector<8x8x8xbf16>, vector<8x8x8xbf16>, vector<8x8x8xf32> -> vector<8x8x8xf32>
    "tpu.trace_stop"() : () -> ()
    %cst_19 = arith.constant 0.353553385 : f32
    %107 = vector.broadcast %cst_19 : f32 to vector<8x8x8xf32>
    %108 = arith.mulf %106, %107 : vector<8x8x8xf32>
    %109 = vector.broadcast %40 : vector<8x1x8xf32> to vector<8x8x8xf32>
    %110 = arith.addf %108, %109 : vector<8x8x8xf32>
    %cst_20 = arith.constant dense<0xFF800000> : vector<8x8xf32>
    %111 = vector.multi_reduction <maximumf>, %110, %cst_20 [2] : vector<8x8x8xf32> to vector<8x8xf32>
    %112 = vector.shape_cast %111 : vector<8x8xf32> to vector<8x8x1xf32>
    %113 = vector.broadcast %112 : vector<8x8x1xf32> to vector<8x8x8xf32>
    %114 = arith.subf %110, %113 : vector<8x8x8xf32>
    %115 = math.exp %114 : vector<8x8x8xf32>
    %cst_21 = arith.constant dense<0.000000e+00> : vector<8x8xf32>
    %116 = vector.multi_reduction <add>, %115, %cst_21 [2] : vector<8x8x8xf32> to vector<8x8xf32>
    %117 = vector.shape_cast %116 : vector<8x8xf32> to vector<8x8x1xf32>
    %118 = tpu.reciprocal %117 {approx = true} : vector<8x8x1xf32> -> vector<8x8x1xf32>
    %119 = vector.broadcast %118 : vector<8x8x1xf32> to vector<8x8x8xf32>
    %120 = arith.mulf %115, %119 : vector<8x8x8xf32>
    %121 = arith.truncf %120 : vector<8x8x8xf32> to vector<8x8x8xbf16>
    "tpu.trace_start"() <{level = 10 : i32, message = "gqk,gkd->gqd"}> : () -> ()
    %cst_22 = arith.constant dense<0.000000e+00> : vector<8x8x8xf32>
    %122 = tpu.matmul %121, %105, %cst_22 {dimension_numbers = #tpu.dot_dimension_numbers<[2], [1], [1], [2], [0, 0, 0, 1, 1, 2], [0], [0]>} : vector<8x8x8xbf16>, vector<8x8x8xbf16>, vector<8x8x8xf32> -> vector<8x8x8xf32>
    "tpu.trace_stop"() : () -> ()
    %123 = vector.extract_strided_slice %122 {offsets = [0, 0, 0], sizes = [1, 8, 8], strides = [1, 1, 1]} : vector<8x8x8xf32> to vector<1x8x8xf32>
    %124 = vector.shape_cast %123 : vector<1x8x8xf32> to vector<8x8xf32>
    %125 = vector.extract_strided_slice %122 {offsets = [1, 0, 0], sizes = [1, 8, 8], strides = [1, 1, 1]} : vector<8x8x8xf32> to vector<1x8x8xf32>
    %126 = vector.shape_cast %125 : vector<1x8x8xf32> to vector<8x8xf32>
    %127 = vector.extract_strided_slice %122 {offsets = [2, 0, 0], sizes = [1, 8, 8], strides = [1, 1, 1]} : vector<8x8x8xf32> to vector<1x8x8xf32>
    %128 = vector.shape_cast %127 : vector<1x8x8xf32> to vector<8x8xf32>
    %129 = vector.extract_strided_slice %122 {offsets = [3, 0, 0], sizes = [1, 8, 8], strides = [1, 1, 1]} : vector<8x8x8xf32> to vector<1x8x8xf32>
    %130 = vector.shape_cast %129 : vector<1x8x8xf32> to vector<8x8xf32>
    %131 = tpu.concatenate %124, %126, %128, %130 in 1 : vector<8x8xf32>, vector<8x8xf32>, vector<8x8xf32>, vector<8x8xf32> -> vector<8x32xf32>
    %132 = vector.extract_strided_slice %122 {offsets = [4, 0, 0], sizes = [1, 8, 8], strides = [1, 1, 1]} : vector<8x8x8xf32> to vector<1x8x8xf32>
    %133 = vector.shape_cast %132 : vector<1x8x8xf32> to vector<8x8xf32>
    %134 = vector.extract_strided_slice %122 {offsets = [5, 0, 0], sizes = [1, 8, 8], strides = [1, 1, 1]} : vector<8x8x8xf32> to vector<1x8x8xf32>
    %135 = vector.shape_cast %134 : vector<1x8x8xf32> to vector<8x8xf32>
    %136 = vector.extract_strided_slice %122 {offsets = [6, 0, 0], sizes = [1, 8, 8], strides = [1, 1, 1]} : vector<8x8x8xf32> to vector<1x8x8xf32>
    %137 = vector.shape_cast %136 : vector<1x8x8xf32> to vector<8x8xf32>
    %138 = vector.extract_strided_slice %122 {offsets = [7, 0, 0], sizes = [1, 8, 8], strides = [1, 1, 1]} : vector<8x8x8xf32> to vector<1x8x8xf32>
    %139 = vector.shape_cast %138 : vector<1x8x8xf32> to vector<8x8xf32>
    %140 = tpu.concatenate %133, %135, %137, %139 in 1 : vector<8x8xf32>, vector<8x8xf32>, vector<8x8xf32>, vector<8x8xf32> -> vector<8x32xf32>
    %141 = tpu.concatenate %131, %140 in 0 : vector<8x32xf32>, vector<8x32xf32> -> vector<16x32xf32>
    %c0_23 = arith.constant 0 : index
    %c0_24 = arith.constant 0 : index
    %c0_25 = arith.constant 0 : index
    %142 = vector.load %arg6[%c0_23, %c0_24, %c0_25] : memref<2x32x32xbf16, #tpu.memory_space<vmem>>, vector<1x32x32xbf16>
    %143 = vector.shape_cast %142 : vector<1x32x32xbf16> to vector<32x32xbf16>
    %c0_26 = arith.constant 0 : index
    %c0_27 = arith.constant 0 : index
    %c0_28 = arith.constant 0 : index
    %144 = vector.load %arg7[%c0_26, %c0_27, %c0_28] : memref<2x1x32xf32, #tpu.memory_space<vmem>>, vector<1x1x32xf32>
    %145 = vector.shape_cast %144 : vector<1x1x32xf32> to vector<1x32xf32>
    %146 = arith.truncf %141 : vector<16x32xf32> to vector<16x32xbf16>
    %cst_29 = arith.constant dense<0.000000e+00> : vector<16x32xf32>
    %147 = tpu.matmul %146, %143, %cst_29 {dimension_numbers = #tpu.dot_dimension_numbers<[1], [1], [0], [0], [0, 0, 1, 0], [], []>} : vector<16x32xbf16>, vector<32x32xbf16>, vector<16x32xf32> -> vector<16x32xf32>
    %148 = vector.broadcast %145 : vector<1x32xf32> to vector<16x32xf32>
    %149 = arith.addf %147, %148 : vector<16x32xf32>
    %150 = arith.addf %22, %149 : vector<16x32xf32>
    %c0_30 = arith.constant 0 : index
    %c0_31 = arith.constant 0 : index
    %c0_32 = arith.constant 0 : index
    %151 = vector.load %arg8[%c0_30, %c0_31, %c0_32] : memref<2x1x32xf32, #tpu.memory_space<vmem>>, vector<1x1x32xf32>
    %152 = vector.shape_cast %151 : vector<1x1x32xf32> to vector<1x32xf32>
    %c0_33 = arith.constant 0 : index
    %c0_34 = arith.constant 0 : index
    %c0_35 = arith.constant 0 : index
    %153 = vector.load %arg9[%c0_33, %c0_34, %c0_35] : memref<2x1x32xf32, #tpu.memory_space<vmem>>, vector<1x1x32xf32>
    %154 = vector.shape_cast %153 : vector<1x1x32xf32> to vector<1x32xf32>
    %cst_36 = arith.constant dense<0.000000e+00> : vector<16xf32>
    %155 = vector.multi_reduction <add>, %150, %cst_36 [1] : vector<16x32xf32> to vector<16xf32>
    %156 = vector.shape_cast %155 : vector<16xf32> to vector<16x1xf32>
    %cst_37 = arith.constant 3.200000e+01 : f32
    %157 = vector.broadcast %cst_37 : f32 to vector<16x1xf32>
    %158 = arith.divf %156, %157 : vector<16x1xf32>
    %159 = vector.broadcast %158 : vector<16x1xf32> to vector<16x32xf32>
    %160 = arith.subf %150, %159 : vector<16x32xf32>
    %161 = arith.mulf %160, %160 : vector<16x32xf32>
    %cst_38 = arith.constant dense<0.000000e+00> : vector<16xf32>
    %162 = vector.multi_reduction <add>, %161, %cst_38 [1] : vector<16x32xf32> to vector<16xf32>
    %163 = vector.shape_cast %162 : vector<16xf32> to vector<16x1xf32>
    %cst_39 = arith.constant 3.200000e+01 : f32
    %164 = vector.broadcast %cst_39 : f32 to vector<16x1xf32>
    %165 = arith.divf %163, %164 : vector<16x1xf32>
    %cst_40 = arith.constant 9.99999996E-13 : f32
    %166 = vector.broadcast %cst_40 : f32 to vector<16x1xf32>
    %167 = arith.addf %165, %166 : vector<16x1xf32>
    %168 = math.rsqrt %167 : vector<16x1xf32>
    %169 = vector.broadcast %168 : vector<16x1xf32> to vector<16x32xf32>
    %170 = arith.mulf %160, %169 : vector<16x32xf32>
    %171 = vector.broadcast %152 : vector<1x32xf32> to vector<16x32xf32>
    %172 = arith.mulf %170, %171 : vector<16x32xf32>
    %173 = vector.broadcast %154 : vector<1x32xf32> to vector<16x32xf32>
    %174 = arith.addf %172, %173 : vector<16x32xf32>
    %c0_41 = arith.constant 0 : index
    %c0_42 = arith.constant 0 : index
    %c0_43 = arith.constant 0 : index
    %175 = vector.load %arg10[%c0_41, %c0_42, %c0_43] : memref<2x64x32xbf16, #tpu.memory_space<vmem>>, vector<1x64x32xbf16>
    %176 = vector.shape_cast %175 : vector<1x64x32xbf16> to vector<64x32xbf16>
    %c0_44 = arith.constant 0 : index
    %c0_45 = arith.constant 0 : index
    %c0_46 = arith.constant 0 : index
    %177 = vector.load %arg11[%c0_44, %c0_45, %c0_46] : memref<2x1x64xf32, #tpu.memory_space<vmem>>, vector<1x1x64xf32>
    %178 = vector.shape_cast %177 : vector<1x1x64xf32> to vector<1x64xf32>
    %179 = arith.truncf %174 : vector<16x32xf32> to vector<16x32xbf16>
    %cst_47 = arith.constant dense<0.000000e+00> : vector<16x64xf32>
    %180 = tpu.matmul %179, %176, %cst_47 {dimension_numbers = #tpu.dot_dimension_numbers<[1], [1], [0], [0], [0, 0, 1, 0], [], []>} : vector<16x32xbf16>, vector<64x32xbf16>, vector<16x64xf32> -> vector<16x64xf32>
    %181 = vector.broadcast %178 : vector<1x64xf32> to vector<16x64xf32>
    %182 = arith.addf %180, %181 : vector<16x64xf32>
    %cst_48 = arith.constant 5.000000e-01 : f32
    %183 = vector.broadcast %cst_48 : f32 to vector<16x64xf32>
    %184 = arith.mulf %183, %182 : vector<16x64xf32>
    %cst_49 = arith.constant 4.471500e-02 : f32
    %185 = vector.broadcast %cst_49 : f32 to vector<16x64xf32>
    %186 = arith.mulf %185, %182 : vector<16x64xf32>
    %187 = arith.mulf %186, %182 : vector<16x64xf32>
    %188 = arith.mulf %187, %182 : vector<16x64xf32>
    %189 = arith.addf %182, %188 : vector<16x64xf32>
    %cst_50 = arith.constant 0.797884583 : f32
    %190 = vector.broadcast %cst_50 : f32 to vector<16x64xf32>
    %191 = arith.mulf %190, %189 : vector<16x64xf32>
    %192 = math.tanh %191 : vector<16x64xf32>
    %cst_51 = arith.constant 1.000000e+00 : f32
    %193 = vector.broadcast %cst_51 : f32 to vector<16x64xf32>
    %194 = arith.addf %193, %192 : vector<16x64xf32>
    %195 = arith.mulf %184, %194 : vector<16x64xf32>
    %c0_52 = arith.constant 0 : index
    %c0_53 = arith.constant 0 : index
    %c0_54 = arith.constant 0 : index
    %196 = vector.load %arg12[%c0_52, %c0_53, %c0_54] : memref<2x32x64xbf16, #tpu.memory_space<vmem>>, vector<1x32x64xbf16>
    %197 = vector.shape_cast %196 : vector<1x32x64xbf16> to vector<32x64xbf16>
    %c0_55 = arith.constant 0 : index
    %c0_56 = arith.constant 0 : index
    %c0_57 = arith.constant 0 : index
    %198 = vector.load %arg13[%c0_55, %c0_56, %c0_57] : memref<2x1x32xf32, #tpu.memory_space<vmem>>, vector<1x1x32xf32>
    %199 = vector.shape_cast %198 : vector<1x1x32xf32> to vector<1x32xf32>
    %200 = arith.truncf %195 : vector<16x64xf32> to vector<16x64xbf16>
    %cst_58 = arith.constant dense<0.000000e+00> : vector<16x32xf32>
    %201 = tpu.matmul %200, %197, %cst_58 {dimension_numbers = #tpu.dot_dimension_numbers<[1], [1], [0], [0], [0, 0, 1, 0], [], []>} : vector<16x64xbf16>, vector<32x64xbf16>, vector<16x32xf32> -> vector<16x32xf32>
    %202 = vector.broadcast %199 : vector<1x32xf32> to vector<16x32xf32>
    %203 = arith.addf %201, %202 : vector<16x32xf32>
    %204 = arith.addf %174, %203 : vector<16x32xf32>
    %c0_59 = arith.constant 0 : index
    %c0_60 = arith.constant 0 : index
    %c0_61 = arith.constant 0 : index
    %205 = vector.load %arg14[%c0_59, %c0_60, %c0_61] : memref<2x1x32xf32, #tpu.memory_space<vmem>>, vector<1x1x32xf32>
    %206 = vector.shape_cast %205 : vector<1x1x32xf32> to vector<1x32xf32>
    %c0_62 = arith.constant 0 : index
    %c0_63 = arith.constant 0 : index
    %c0_64 = arith.constant 0 : index
    %207 = vector.load %arg15[%c0_62, %c0_63, %c0_64] : memref<2x1x32xf32, #tpu.memory_space<vmem>>, vector<1x1x32xf32>
    %208 = vector.shape_cast %207 : vector<1x1x32xf32> to vector<1x32xf32>
    %cst_65 = arith.constant dense<0.000000e+00> : vector<16xf32>
    %209 = vector.multi_reduction <add>, %204, %cst_65 [1] : vector<16x32xf32> to vector<16xf32>
    %210 = vector.shape_cast %209 : vector<16xf32> to vector<16x1xf32>
    %cst_66 = arith.constant 3.200000e+01 : f32
    %211 = vector.broadcast %cst_66 : f32 to vector<16x1xf32>
    %212 = arith.divf %210, %211 : vector<16x1xf32>
    %213 = vector.broadcast %212 : vector<16x1xf32> to vector<16x32xf32>
    %214 = arith.subf %204, %213 : vector<16x32xf32>
    %215 = arith.mulf %214, %214 : vector<16x32xf32>
    %cst_67 = arith.constant dense<0.000000e+00> : vector<16xf32>
    %216 = vector.multi_reduction <add>, %215, %cst_67 [1] : vector<16x32xf32> to vector<16xf32>
    %217 = vector.shape_cast %216 : vector<16xf32> to vector<16x1xf32>
    %cst_68 = arith.constant 3.200000e+01 : f32
    %218 = vector.broadcast %cst_68 : f32 to vector<16x1xf32>
    %219 = arith.divf %217, %218 : vector<16x1xf32>
    %cst_69 = arith.constant 9.99999996E-13 : f32
    %220 = vector.broadcast %cst_69 : f32 to vector<16x1xf32>
    %221 = arith.addf %219, %220 : vector<16x1xf32>
    %222 = math.rsqrt %221 : vector<16x1xf32>
    %223 = vector.broadcast %222 : vector<16x1xf32> to vector<16x32xf32>
    %224 = arith.mulf %214, %223 : vector<16x32xf32>
    %225 = vector.broadcast %206 : vector<1x32xf32> to vector<16x32xf32>
    %226 = arith.mulf %224, %225 : vector<16x32xf32>
    %227 = vector.broadcast %208 : vector<1x32xf32> to vector<16x32xf32>
    %228 = arith.addf %226, %227 : vector<16x32xf32>
    %c1 = arith.constant 1 : index
    %c0_70 = arith.constant 0 : index
    %c0_71 = arith.constant 0 : index
    %229 = vector.load %arg4[%c1, %c0_70, %c0_71] : memref<2x96x32xbf16, #tpu.memory_space<vmem>>, vector<1x96x32xbf16>
    %230 = vector.shape_cast %229 : vector<1x96x32xbf16> to vector<96x32xbf16>
    %c1_72 = arith.constant 1 : index
    %c0_73 = arith.constant 0 : index
    %c0_74 = arith.constant 0 : index
    %231 = vector.load %arg5[%c1_72, %c0_73, %c0_74] : memref<2x1x96xf32, #tpu.memory_space<vmem>>, vector<1x1x96xf32>
    %232 = vector.shape_cast %231 : vector<1x1x96xf32> to vector<1x96xf32>
    %233 = arith.truncf %228 : vector<16x32xf32> to vector<16x32xbf16>
    %cst_75 = arith.constant dense<0.000000e+00> : vector<16x96xf32>
    %234 = tpu.matmul %233, %230, %cst_75 {dimension_numbers = #tpu.dot_dimension_numbers<[1], [1], [0], [0], [0, 0, 1, 0], [], []>} : vector<16x32xbf16>, vector<96x32xbf16>, vector<16x96xf32> -> vector<16x96xf32>
    %235 = vector.broadcast %232 : vector<1x96xf32> to vector<16x96xf32>
    %236 = arith.addf %234, %235 : vector<16x96xf32>
    %237 = vector.extract_strided_slice %236 {offsets = [0, 0], sizes = [16, 32], strides = [1, 1]} : vector<16x96xf32> to vector<16x32xf32>
    %238 = vector.extract_strided_slice %236 {offsets = [0, 32], sizes = [16, 32], strides = [1, 1]} : vector<16x96xf32> to vector<16x32xf32>
    %239 = vector.extract_strided_slice %236 {offsets = [0, 64], sizes = [16, 32], strides = [1, 1]} : vector<16x96xf32> to vector<16x32xf32>
    %240 = vector.extract_strided_slice %237 {offsets = [0, 0], sizes = [8, 8], strides = [1, 1]} : vector<16x32xf32> to vector<8x8xf32>
    %241 = vector.extract_strided_slice %237 {offsets = [0, 8], sizes = [8, 8], strides = [1, 1]} : vector<16x32xf32> to vector<8x8xf32>
    %242 = vector.extract_strided_slice %237 {offsets = [0, 16], sizes = [8, 8], strides = [1, 1]} : vector<16x32xf32> to vector<8x8xf32>
    %243 = vector.extract_strided_slice %237 {offsets = [0, 24], sizes = [8, 8], strides = [1, 1]} : vector<16x32xf32> to vector<8x8xf32>
    %244 = vector.extract_strided_slice %237 {offsets = [8, 0], sizes = [8, 8], strides = [1, 1]} : vector<16x32xf32> to vector<8x8xf32>
    %245 = vector.extract_strided_slice %237 {offsets = [8, 8], sizes = [8, 8], strides = [1, 1]} : vector<16x32xf32> to vector<8x8xf32>
    %246 = vector.extract_strided_slice %237 {offsets = [8, 16], sizes = [8, 8], strides = [1, 1]} : vector<16x32xf32> to vector<8x8xf32>
    %247 = vector.extract_strided_slice %237 {offsets = [8, 24], sizes = [8, 8], strides = [1, 1]} : vector<16x32xf32> to vector<8x8xf32>
    %248 = vector.shape_cast %240 : vector<8x8xf32> to vector<1x8x8xf32>
    %249 = vector.shape_cast %241 : vector<8x8xf32> to vector<1x8x8xf32>
    %250 = vector.shape_cast %242 : vector<8x8xf32> to vector<1x8x8xf32>
    %251 = vector.shape_cast %243 : vector<8x8xf32> to vector<1x8x8xf32>
    %252 = vector.shape_cast %244 : vector<8x8xf32> to vector<1x8x8xf32>
    %253 = vector.shape_cast %245 : vector<8x8xf32> to vector<1x8x8xf32>
    %254 = vector.shape_cast %246 : vector<8x8xf32> to vector<1x8x8xf32>
    %255 = vector.shape_cast %247 : vector<8x8xf32> to vector<1x8x8xf32>
    %256 = tpu.concatenate %248, %249, %250, %251, %252, %253, %254, %255 in 0 : vector<1x8x8xf32>, vector<1x8x8xf32>, vector<1x8x8xf32>, vector<1x8x8xf32>, vector<1x8x8xf32>, vector<1x8x8xf32>, vector<1x8x8xf32>, vector<1x8x8xf32> -> vector<8x8x8xf32>
    %257 = arith.truncf %256 : vector<8x8x8xf32> to vector<8x8x8xbf16>
    %258 = vector.extract_strided_slice %238 {offsets = [0, 0], sizes = [8, 8], strides = [1, 1]} : vector<16x32xf32> to vector<8x8xf32>
    %259 = vector.extract_strided_slice %238 {offsets = [0, 8], sizes = [8, 8], strides = [1, 1]} : vector<16x32xf32> to vector<8x8xf32>
    %260 = vector.extract_strided_slice %238 {offsets = [0, 16], sizes = [8, 8], strides = [1, 1]} : vector<16x32xf32> to vector<8x8xf32>
    %261 = vector.extract_strided_slice %238 {offsets = [0, 24], sizes = [8, 8], strides = [1, 1]} : vector<16x32xf32> to vector<8x8xf32>
    %262 = vector.extract_strided_slice %238 {offsets = [8, 0], sizes = [8, 8], strides = [1, 1]} : vector<16x32xf32> to vector<8x8xf32>
    %263 = vector.extract_strided_slice %238 {offsets = [8, 8], sizes = [8, 8], strides = [1, 1]} : vector<16x32xf32> to vector<8x8xf32>
    %264 = vector.extract_strided_slice %238 {offsets = [8, 16], sizes = [8, 8], strides = [1, 1]} : vector<16x32xf32> to vector<8x8xf32>
    %265 = vector.extract_strided_slice %238 {offsets = [8, 24], sizes = [8, 8], strides = [1, 1]} : vector<16x32xf32> to vector<8x8xf32>
    %266 = vector.shape_cast %258 : vector<8x8xf32> to vector<1x8x8xf32>
    %267 = vector.shape_cast %259 : vector<8x8xf32> to vector<1x8x8xf32>
    %268 = vector.shape_cast %260 : vector<8x8xf32> to vector<1x8x8xf32>
    %269 = vector.shape_cast %261 : vector<8x8xf32> to vector<1x8x8xf32>
    %270 = vector.shape_cast %262 : vector<8x8xf32> to vector<1x8x8xf32>
    %271 = vector.shape_cast %263 : vector<8x8xf32> to vector<1x8x8xf32>
    %272 = vector.shape_cast %264 : vector<8x8xf32> to vector<1x8x8xf32>
    %273 = vector.shape_cast %265 : vector<8x8xf32> to vector<1x8x8xf32>
    %274 = tpu.concatenate %266, %267, %268, %269, %270, %271, %272, %273 in 0 : vector<1x8x8xf32>, vector<1x8x8xf32>, vector<1x8x8xf32>, vector<1x8x8xf32>, vector<1x8x8xf32>, vector<1x8x8xf32>, vector<1x8x8xf32>, vector<1x8x8xf32> -> vector<8x8x8xf32>
    %275 = arith.truncf %274 : vector<8x8x8xf32> to vector<8x8x8xbf16>
    %276 = vector.extract_strided_slice %239 {offsets = [0, 0], sizes = [8, 8], strides = [1, 1]} : vector<16x32xf32> to vector<8x8xf32>
    %277 = vector.extract_strided_slice %239 {offsets = [0, 8], sizes = [8, 8], strides = [1, 1]} : vector<16x32xf32> to vector<8x8xf32>
    %278 = vector.extract_strided_slice %239 {offsets = [0, 16], sizes = [8, 8], strides = [1, 1]} : vector<16x32xf32> to vector<8x8xf32>
    %279 = vector.extract_strided_slice %239 {offsets = [0, 24], sizes = [8, 8], strides = [1, 1]} : vector<16x32xf32> to vector<8x8xf32>
    %280 = vector.extract_strided_slice %239 {offsets = [8, 0], sizes = [8, 8], strides = [1, 1]} : vector<16x32xf32> to vector<8x8xf32>
    %281 = vector.extract_strided_slice %239 {offsets = [8, 8], sizes = [8, 8], strides = [1, 1]} : vector<16x32xf32> to vector<8x8xf32>
    %282 = vector.extract_strided_slice %239 {offsets = [8, 16], sizes = [8, 8], strides = [1, 1]} : vector<16x32xf32> to vector<8x8xf32>
    %283 = vector.extract_strided_slice %239 {offsets = [8, 24], sizes = [8, 8], strides = [1, 1]} : vector<16x32xf32> to vector<8x8xf32>
    %284 = vector.shape_cast %276 : vector<8x8xf32> to vector<1x8x8xf32>
    %285 = vector.shape_cast %277 : vector<8x8xf32> to vector<1x8x8xf32>
    %286 = vector.shape_cast %278 : vector<8x8xf32> to vector<1x8x8xf32>
    %287 = vector.shape_cast %279 : vector<8x8xf32> to vector<1x8x8xf32>
    %288 = vector.shape_cast %280 : vector<8x8xf32> to vector<1x8x8xf32>
    %289 = vector.shape_cast %281 : vector<8x8xf32> to vector<1x8x8xf32>
    %290 = vector.shape_cast %282 : vector<8x8xf32> to vector<1x8x8xf32>
    %291 = vector.shape_cast %283 : vector<8x8xf32> to vector<1x8x8xf32>
    %292 = tpu.concatenate %284, %285, %286, %287, %288, %289, %290, %291 in 0 : vector<1x8x8xf32>, vector<1x8x8xf32>, vector<1x8x8xf32>, vector<1x8x8xf32>, vector<1x8x8xf32>, vector<1x8x8xf32>, vector<1x8x8xf32>, vector<1x8x8xf32> -> vector<8x8x8xf32>
    %293 = arith.truncf %292 : vector<8x8x8xf32> to vector<8x8x8xbf16>
    "tpu.trace_start"() <{level = 10 : i32, message = "gqd,gkd->gqk"}> : () -> ()
    %cst_76 = arith.constant dense<0.000000e+00> : vector<8x8x8xf32>
    %294 = tpu.matmul %257, %275, %cst_76 {dimension_numbers = #tpu.dot_dimension_numbers<[2], [2], [1], [1], [0, 0, 0, 1, 1, 1], [0], [0]>} : vector<8x8x8xbf16>, vector<8x8x8xbf16>, vector<8x8x8xf32> -> vector<8x8x8xf32>
    "tpu.trace_stop"() : () -> ()
    %cst_77 = arith.constant 0.353553385 : f32
    %295 = vector.broadcast %cst_77 : f32 to vector<8x8x8xf32>
    %296 = arith.mulf %294, %295 : vector<8x8x8xf32>
    %297 = vector.broadcast %40 : vector<8x1x8xf32> to vector<8x8x8xf32>
    %298 = arith.addf %296, %297 : vector<8x8x8xf32>
    %cst_78 = arith.constant dense<0xFF800000> : vector<8x8xf32>
    %299 = vector.multi_reduction <maximumf>, %298, %cst_78 [2] : vector<8x8x8xf32> to vector<8x8xf32>
    %300 = vector.shape_cast %299 : vector<8x8xf32> to vector<8x8x1xf32>
    %301 = vector.broadcast %300 : vector<8x8x1xf32> to vector<8x8x8xf32>
    %302 = arith.subf %298, %301 : vector<8x8x8xf32>
    %303 = math.exp %302 : vector<8x8x8xf32>
    %cst_79 = arith.constant dense<0.000000e+00> : vector<8x8xf32>
    %304 = vector.multi_reduction <add>, %303, %cst_79 [2] : vector<8x8x8xf32> to vector<8x8xf32>
    %305 = vector.shape_cast %304 : vector<8x8xf32> to vector<8x8x1xf32>
    %306 = tpu.reciprocal %305 {approx = true} : vector<8x8x1xf32> -> vector<8x8x1xf32>
    %307 = vector.broadcast %306 : vector<8x8x1xf32> to vector<8x8x8xf32>
    %308 = arith.mulf %303, %307 : vector<8x8x8xf32>
    %309 = arith.truncf %308 : vector<8x8x8xf32> to vector<8x8x8xbf16>
    "tpu.trace_start"() <{level = 10 : i32, message = "gqk,gkd->gqd"}> : () -> ()
    %cst_80 = arith.constant dense<0.000000e+00> : vector<8x8x8xf32>
    %310 = tpu.matmul %309, %293, %cst_80 {dimension_numbers = #tpu.dot_dimension_numbers<[2], [1], [1], [2], [0, 0, 0, 1, 1, 2], [0], [0]>} : vector<8x8x8xbf16>, vector<8x8x8xbf16>, vector<8x8x8xf32> -> vector<8x8x8xf32>
    "tpu.trace_stop"() : () -> ()
    %311 = vector.extract_strided_slice %310 {offsets = [0, 0, 0], sizes = [1, 8, 8], strides = [1, 1, 1]} : vector<8x8x8xf32> to vector<1x8x8xf32>
    %312 = vector.shape_cast %311 : vector<1x8x8xf32> to vector<8x8xf32>
    %313 = vector.extract_strided_slice %310 {offsets = [1, 0, 0], sizes = [1, 8, 8], strides = [1, 1, 1]} : vector<8x8x8xf32> to vector<1x8x8xf32>
    %314 = vector.shape_cast %313 : vector<1x8x8xf32> to vector<8x8xf32>
    %315 = vector.extract_strided_slice %310 {offsets = [2, 0, 0], sizes = [1, 8, 8], strides = [1, 1, 1]} : vector<8x8x8xf32> to vector<1x8x8xf32>
    %316 = vector.shape_cast %315 : vector<1x8x8xf32> to vector<8x8xf32>
    %317 = vector.extract_strided_slice %310 {offsets = [3, 0, 0], sizes = [1, 8, 8], strides = [1, 1, 1]} : vector<8x8x8xf32> to vector<1x8x8xf32>
    %318 = vector.shape_cast %317 : vector<1x8x8xf32> to vector<8x8xf32>
    %319 = tpu.concatenate %312, %314, %316, %318 in 1 : vector<8x8xf32>, vector<8x8xf32>, vector<8x8xf32>, vector<8x8xf32> -> vector<8x32xf32>
    %320 = vector.extract_strided_slice %310 {offsets = [4, 0, 0], sizes = [1, 8, 8], strides = [1, 1, 1]} : vector<8x8x8xf32> to vector<1x8x8xf32>
    %321 = vector.shape_cast %320 : vector<1x8x8xf32> to vector<8x8xf32>
    %322 = vector.extract_strided_slice %310 {offsets = [5, 0, 0], sizes = [1, 8, 8], strides = [1, 1, 1]} : vector<8x8x8xf32> to vector<1x8x8xf32>
    %323 = vector.shape_cast %322 : vector<1x8x8xf32> to vector<8x8xf32>
    %324 = vector.extract_strided_slice %310 {offsets = [6, 0, 0], sizes = [1, 8, 8], strides = [1, 1, 1]} : vector<8x8x8xf32> to vector<1x8x8xf32>
    %325 = vector.shape_cast %324 : vector<1x8x8xf32> to vector<8x8xf32>
    %326 = vector.extract_strided_slice %310 {offsets = [7, 0, 0], sizes = [1, 8, 8], strides = [1, 1, 1]} : vector<8x8x8xf32> to vector<1x8x8xf32>
    %327 = vector.shape_cast %326 : vector<1x8x8xf32> to vector<8x8xf32>
    %328 = tpu.concatenate %321, %323, %325, %327 in 1 : vector<8x8xf32>, vector<8x8xf32>, vector<8x8xf32>, vector<8x8xf32> -> vector<8x32xf32>
    %329 = tpu.concatenate %319, %328 in 0 : vector<8x32xf32>, vector<8x32xf32> -> vector<16x32xf32>
    %c1_81 = arith.constant 1 : index
    %c0_82 = arith.constant 0 : index
    %c0_83 = arith.constant 0 : index
    %330 = vector.load %arg6[%c1_81, %c0_82, %c0_83] : memref<2x32x32xbf16, #tpu.memory_space<vmem>>, vector<1x32x32xbf16>
    %331 = vector.shape_cast %330 : vector<1x32x32xbf16> to vector<32x32xbf16>
    %c1_84 = arith.constant 1 : index
    %c0_85 = arith.constant 0 : index
    %c0_86 = arith.constant 0 : index
    %332 = vector.load %arg7[%c1_84, %c0_85, %c0_86] : memref<2x1x32xf32, #tpu.memory_space<vmem>>, vector<1x1x32xf32>
    %333 = vector.shape_cast %332 : vector<1x1x32xf32> to vector<1x32xf32>
    %334 = arith.truncf %329 : vector<16x32xf32> to vector<16x32xbf16>
    %cst_87 = arith.constant dense<0.000000e+00> : vector<16x32xf32>
    %335 = tpu.matmul %334, %331, %cst_87 {dimension_numbers = #tpu.dot_dimension_numbers<[1], [1], [0], [0], [0, 0, 1, 0], [], []>} : vector<16x32xbf16>, vector<32x32xbf16>, vector<16x32xf32> -> vector<16x32xf32>
    %336 = vector.broadcast %333 : vector<1x32xf32> to vector<16x32xf32>
    %337 = arith.addf %335, %336 : vector<16x32xf32>
    %338 = arith.addf %228, %337 : vector<16x32xf32>
    %c1_88 = arith.constant 1 : index
    %c0_89 = arith.constant 0 : index
    %c0_90 = arith.constant 0 : index
    %339 = vector.load %arg8[%c1_88, %c0_89, %c0_90] : memref<2x1x32xf32, #tpu.memory_space<vmem>>, vector<1x1x32xf32>
    %340 = vector.shape_cast %339 : vector<1x1x32xf32> to vector<1x32xf32>
    %c1_91 = arith.constant 1 : index
    %c0_92 = arith.constant 0 : index
    %c0_93 = arith.constant 0 : index
    %341 = vector.load %arg9[%c1_91, %c0_92, %c0_93] : memref<2x1x32xf32, #tpu.memory_space<vmem>>, vector<1x1x32xf32>
    %342 = vector.shape_cast %341 : vector<1x1x32xf32> to vector<1x32xf32>
    %cst_94 = arith.constant dense<0.000000e+00> : vector<16xf32>
    %343 = vector.multi_reduction <add>, %338, %cst_94 [1] : vector<16x32xf32> to vector<16xf32>
    %344 = vector.shape_cast %343 : vector<16xf32> to vector<16x1xf32>
    %cst_95 = arith.constant 3.200000e+01 : f32
    %345 = vector.broadcast %cst_95 : f32 to vector<16x1xf32>
    %346 = arith.divf %344, %345 : vector<16x1xf32>
    %347 = vector.broadcast %346 : vector<16x1xf32> to vector<16x32xf32>
    %348 = arith.subf %338, %347 : vector<16x32xf32>
    %349 = arith.mulf %348, %348 : vector<16x32xf32>
    %cst_96 = arith.constant dense<0.000000e+00> : vector<16xf32>
    %350 = vector.multi_reduction <add>, %349, %cst_96 [1] : vector<16x32xf32> to vector<16xf32>
    %351 = vector.shape_cast %350 : vector<16xf32> to vector<16x1xf32>
    %cst_97 = arith.constant 3.200000e+01 : f32
    %352 = vector.broadcast %cst_97 : f32 to vector<16x1xf32>
    %353 = arith.divf %351, %352 : vector<16x1xf32>
    %cst_98 = arith.constant 9.99999996E-13 : f32
    %354 = vector.broadcast %cst_98 : f32 to vector<16x1xf32>
    %355 = arith.addf %353, %354 : vector<16x1xf32>
    %356 = math.rsqrt %355 : vector<16x1xf32>
    %357 = vector.broadcast %356 : vector<16x1xf32> to vector<16x32xf32>
    %358 = arith.mulf %348, %357 : vector<16x32xf32>
    %359 = vector.broadcast %340 : vector<1x32xf32> to vector<16x32xf32>
    %360 = arith.mulf %358, %359 : vector<16x32xf32>
    %361 = vector.broadcast %342 : vector<1x32xf32> to vector<16x32xf32>
    %362 = arith.addf %360, %361 : vector<16x32xf32>
    %c1_99 = arith.constant 1 : index
    %c0_100 = arith.constant 0 : index
    %c0_101 = arith.constant 0 : index
    %363 = vector.load %arg10[%c1_99, %c0_100, %c0_101] : memref<2x64x32xbf16, #tpu.memory_space<vmem>>, vector<1x64x32xbf16>
    %364 = vector.shape_cast %363 : vector<1x64x32xbf16> to vector<64x32xbf16>
    %c1_102 = arith.constant 1 : index
    %c0_103 = arith.constant 0 : index
    %c0_104 = arith.constant 0 : index
    %365 = vector.load %arg11[%c1_102, %c0_103, %c0_104] : memref<2x1x64xf32, #tpu.memory_space<vmem>>, vector<1x1x64xf32>
    %366 = vector.shape_cast %365 : vector<1x1x64xf32> to vector<1x64xf32>
    %367 = arith.truncf %362 : vector<16x32xf32> to vector<16x32xbf16>
    %cst_105 = arith.constant dense<0.000000e+00> : vector<16x64xf32>
    %368 = tpu.matmul %367, %364, %cst_105 {dimension_numbers = #tpu.dot_dimension_numbers<[1], [1], [0], [0], [0, 0, 1, 0], [], []>} : vector<16x32xbf16>, vector<64x32xbf16>, vector<16x64xf32> -> vector<16x64xf32>
    %369 = vector.broadcast %366 : vector<1x64xf32> to vector<16x64xf32>
    %370 = arith.addf %368, %369 : vector<16x64xf32>
    %cst_106 = arith.constant 5.000000e-01 : f32
    %371 = vector.broadcast %cst_106 : f32 to vector<16x64xf32>
    %372 = arith.mulf %371, %370 : vector<16x64xf32>
    %cst_107 = arith.constant 4.471500e-02 : f32
    %373 = vector.broadcast %cst_107 : f32 to vector<16x64xf32>
    %374 = arith.mulf %373, %370 : vector<16x64xf32>
    %375 = arith.mulf %374, %370 : vector<16x64xf32>
    %376 = arith.mulf %375, %370 : vector<16x64xf32>
    %377 = arith.addf %370, %376 : vector<16x64xf32>
    %cst_108 = arith.constant 0.797884583 : f32
    %378 = vector.broadcast %cst_108 : f32 to vector<16x64xf32>
    %379 = arith.mulf %378, %377 : vector<16x64xf32>
    %380 = math.tanh %379 : vector<16x64xf32>
    %cst_109 = arith.constant 1.000000e+00 : f32
    %381 = vector.broadcast %cst_109 : f32 to vector<16x64xf32>
    %382 = arith.addf %381, %380 : vector<16x64xf32>
    %383 = arith.mulf %372, %382 : vector<16x64xf32>
    %c1_110 = arith.constant 1 : index
    %c0_111 = arith.constant 0 : index
    %c0_112 = arith.constant 0 : index
    %384 = vector.load %arg12[%c1_110, %c0_111, %c0_112] : memref<2x32x64xbf16, #tpu.memory_space<vmem>>, vector<1x32x64xbf16>
    %385 = vector.shape_cast %384 : vector<1x32x64xbf16> to vector<32x64xbf16>
    %c1_113 = arith.constant 1 : index
    %c0_114 = arith.constant 0 : index
    %c0_115 = arith.constant 0 : index
    %386 = vector.load %arg13[%c1_113, %c0_114, %c0_115] : memref<2x1x32xf32, #tpu.memory_space<vmem>>, vector<1x1x32xf32>
    %387 = vector.shape_cast %386 : vector<1x1x32xf32> to vector<1x32xf32>
    %388 = arith.truncf %383 : vector<16x64xf32> to vector<16x64xbf16>
    %cst_116 = arith.constant dense<0.000000e+00> : vector<16x32xf32>
    %389 = tpu.matmul %388, %385, %cst_116 {dimension_numbers = #tpu.dot_dimension_numbers<[1], [1], [0], [0], [0, 0, 1, 0], [], []>} : vector<16x64xbf16>, vector<32x64xbf16>, vector<16x32xf32> -> vector<16x32xf32>
    %390 = vector.broadcast %387 : vector<1x32xf32> to vector<16x32xf32>
    %391 = arith.addf %389, %390 : vector<16x32xf32>
    %392 = arith.addf %362, %391 : vector<16x32xf32>
    %c1_117 = arith.constant 1 : index
    %c0_118 = arith.constant 0 : index
    %c0_119 = arith.constant 0 : index
    %393 = vector.load %arg14[%c1_117, %c0_118, %c0_119] : memref<2x1x32xf32, #tpu.memory_space<vmem>>, vector<1x1x32xf32>
    %394 = vector.shape_cast %393 : vector<1x1x32xf32> to vector<1x32xf32>
    %c1_120 = arith.constant 1 : index
    %c0_121 = arith.constant 0 : index
    %c0_122 = arith.constant 0 : index
    %395 = vector.load %arg15[%c1_120, %c0_121, %c0_122] : memref<2x1x32xf32, #tpu.memory_space<vmem>>, vector<1x1x32xf32>
    %396 = vector.shape_cast %395 : vector<1x1x32xf32> to vector<1x32xf32>
    %cst_123 = arith.constant dense<0.000000e+00> : vector<16xf32>
    %397 = vector.multi_reduction <add>, %392, %cst_123 [1] : vector<16x32xf32> to vector<16xf32>
    %398 = vector.shape_cast %397 : vector<16xf32> to vector<16x1xf32>
    %cst_124 = arith.constant 3.200000e+01 : f32
    %399 = vector.broadcast %cst_124 : f32 to vector<16x1xf32>
    %400 = arith.divf %398, %399 : vector<16x1xf32>
    %401 = vector.broadcast %400 : vector<16x1xf32> to vector<16x32xf32>
    %402 = arith.subf %392, %401 : vector<16x32xf32>
    %403 = arith.mulf %402, %402 : vector<16x32xf32>
    %cst_125 = arith.constant dense<0.000000e+00> : vector<16xf32>
    %404 = vector.multi_reduction <add>, %403, %cst_125 [1] : vector<16x32xf32> to vector<16xf32>
    %405 = vector.shape_cast %404 : vector<16xf32> to vector<16x1xf32>
    %cst_126 = arith.constant 3.200000e+01 : f32
    %406 = vector.broadcast %cst_126 : f32 to vector<16x1xf32>
    %407 = arith.divf %405, %406 : vector<16x1xf32>
    %cst_127 = arith.constant 9.99999996E-13 : f32
    %408 = vector.broadcast %cst_127 : f32 to vector<16x1xf32>
    %409 = arith.addf %407, %408 : vector<16x1xf32>
    %410 = math.rsqrt %409 : vector<16x1xf32>
    %411 = vector.broadcast %410 : vector<16x1xf32> to vector<16x32xf32>
    %412 = arith.mulf %402, %411 : vector<16x32xf32>
    %413 = vector.broadcast %394 : vector<1x32xf32> to vector<16x32xf32>
    %414 = arith.mulf %412, %413 : vector<16x32xf32>
    %415 = vector.broadcast %396 : vector<1x32xf32> to vector<16x32xf32>
    %416 = arith.addf %414, %415 : vector<16x32xf32>
    %c0_128 = arith.constant 0 : index
    %c0_129 = arith.constant 0 : index
    %417 = vector.load %arg16[%c0_128, %c0_129] : memref<2x32xbf16, #tpu.memory_space<vmem>>, vector<2x32xbf16>
    %418 = arith.truncf %416 : vector<16x32xf32> to vector<16x32xbf16>
    %cst_130 = arith.constant dense<0.000000e+00> : vector<2x16xf32>
    %419 = tpu.matmul %417, %418, %cst_130 {dimension_numbers = #tpu.dot_dimension_numbers<[1], [1], [0], [0], [0, 0, 1, 0], [], []>} : vector<2x32xbf16>, vector<16x32xbf16>, vector<2x16xf32> -> vector<2x16xf32>
    %c0_131 = arith.constant 0 : index
    %c0_132 = arith.constant 0 : index
    %420 = vector.load %arg17[%c0_131, %c0_132] : memref<2x1xf32, #tpu.memory_space<vmem>>, vector<2x1xf32>
    %421 = vector.broadcast %420 : vector<2x1xf32> to vector<2x16xf32>
    %422 = arith.addf %419, %421 : vector<2x16xf32>
    %423 = vector.extract_strided_slice %422 {offsets = [0, 0], sizes = [1, 16], strides = [1, 1]} : vector<2x16xf32> to vector<1x16xf32>
    %c0_133 = arith.constant 0 : index
    %c0_134 = arith.constant 0 : index
    %424 = vector.load %arg18[%c0_133, %c0_134] : memref<1x16xf32, #tpu.memory_space<vmem>>, vector<1x16xf32>
    tpu.vector_store %arg18[%c0_133, %c0_134], %423 {strides = array<i32>} : memref<1x16xf32, #tpu.memory_space<vmem>>, vector<1x16xf32>,
    %425 = vector.extract_strided_slice %422 {offsets = [1, 0], sizes = [1, 16], strides = [1, 1]} : vector<2x16xf32> to vector<1x16xf32>
    %c0_135 = arith.constant 0 : index
    %c0_136 = arith.constant 0 : index
    %426 = vector.load %arg19[%c0_135, %c0_136] : memref<1x16xf32, #tpu.memory_space<vmem>>, vector<1x16xf32>
    tpu.vector_store %arg19[%c0_135, %c0_136], %425 {strides = array<i32>} : memref<1x16xf32, #tpu.memory_space<vmem>>, vector<1x16xf32>,
    return
  }
}

</mosaic_0001>

<bundles_post_ra>
// kernel: forward.1
= control target key start
LH: loop header
LB: loop body
LE: loop exit
PB: predicated region body
PF: predicated region fallthrough
CT: control target
= control target key end

     0   :  { %vm66_vm0 = vcmask 261120   ;;  %v3686_v4 = vmov 0.0   ;;  %vm3687_vm1 = vmmov 0   ;;  %s3688_s27 = smov 112   ;;  %s3689_s28 = smov 120   ;;  %vm257_vm2 = vcmask 64512   ;;  %s4522_s0 = inlined_call_operand.vmem [shape: f32[16,32], index: 0, kind: input, shape index: {}]   ;;  %s4523_s4 = inlined_call_operand.vmem [shape: bf16[2,96,32], index: 4, kind: input, shape index: {}]   ;;  %s4524_s2 = inlined_call_operand.vmem [shape: f32[1,32], index: 2, kind: input, shape index: {}]   ;;  %s4525_s3 = inlined_call_operand.vmem [shape: f32[1,32], index: 3, kind: input, shape index: {}]   ;;  %s4526_s5 = inlined_call_operand.vmem [shape: f32[2,1,96], index: 5, kind: input, shape index: {}]   ;;  %s4527_s1 = inlined_call_operand.vmem [shape: f32[2,8], index: 1, kind: input, shape index: {}]   ;;  %s4528_s6 = inlined_call_operand.vmem [shape: bf16[2,32,32], index: 6, kind: input, shape index: {}]   ;;  %s4529_s7 = inlined_call_operand.vmem [shape: f32[2,1,32], index: 7, kind: input, shape index: {}]   ;;  %s4530_s10 = inlined_call_operand.vmem [shape: bf16[2,64,32], index: 10, kind: input, shape index: {}]   ;;  %s4531_s8 = inlined_call_operand.vmem [shape: f32[2,1,32], index: 8, kind: input, shape index: {}]   ;;  %s4532_s9 = inlined_call_operand.vmem [shape: f32[2,1,32], index: 9, kind: input, shape index: {}]   ;;  %s4533_s12 = inlined_call_operand.vmem [shape: bf16[2,32,64], index: 12, kind: input, shape index: {}]   ;;  %s4534_s11 = inlined_call_operand.vmem [shape: f32[2,1,64], index: 11, kind: input, shape index: {}]   ;;  %s4535_s13 = inlined_call_operand.vmem [shape: f32[2,1,32], index: 13, kind: input, shape index: {}]   ;;  %s4536_s14 = inlined_call_operand.vmem [shape: f32[2,1,32], index: 14, kind: input, shape index: {}]   ;;  %s4537_s15 = inlined_call_operand.vmem [shape: f32[2,1,32], index: 15, kind: input, shape index: {}]   ;;  %s4538_s17 = inlined_call_operand.vmem [shape: f32[2,1], index: 17, kind: input, shape index: {}]   ;;  %s4539_s16 = inlined_call_operand.vmem [shape: bf16[2,32], index: 16, kind: input, shape index: {}]   ;;  %s4540_s18 = inlined_call_operand.vmem [shape: f32[1,16], index: 18, kind: output, shape index: {0}]   ;;  %s4541_s19 = inlined_call_operand.vmem [shape: f32[1,16], index: 19, kind: output, shape index: {1}]  }
   0x1   :  { %4544 = sst [smem:[#allocation2_spill]] %s4522_s0  ;;  %3238 = vmatprep.subr.bf16.mxu0 %v3686_v4  ;;  %3254 = vmatprep.subr.bf16.mxu1 %v3686_v4  ;;  %v3015_v44 = vld [vmem:[%s4526_s5] ss:$0 sm:$0xff]  ;;  %s3690_s29 = smov 104   ;;  %vm772_vm3 = vcmask 1043456   ;;  %vm1165_vm4 = vcmask 130048  }
   0x2   :  { %4545 = sst [smem:[#allocation3_spill]] %s4523_s4  ;;  %s4548_s20 = sld [smem:[#allocation2_spill]]  ;;  %3250 = vmatprep.mubr.msk.bf16.mxu0 %vm3687_vm1, %v3686_v4  ;;  %3256 = vmatprep.mubr.msk.bf16.mxu1 %vm3687_vm1, %v3686_v4  ;;  %vm1167_vm5 = vcmask 195584   ;;  %vm1434_vm6 = vcmask 523264   ;;  %vm3001_vm7 = vcmask 122880   ;;  %vm3003_vm8 = vcmask 123905  }
   0x3   :  { %4546 = sst [smem:[#allocation4_spill]] %s4524_s2  ;;  %s4549_s23 = sld [smem:[#allocation3_spill]] }
   0x4   :  { %4547 = sst [smem:[#allocation5_spill]] %s4525_s3  ;;  %s4550_s22 = sld [smem:[#allocation4_spill]] }
   0x5   :  { %s4551_s25 = sld [smem:[#allocation5_spill]]  ;;  %s3691_s0 = smov 96  }
   0x6   :  { %s3695_s3 = smov 24  }
   0x8   :  { %v62_v0 = vld [vmem:[%s4548_s20] sm:$0xff]  ;;  %v63_v1 = vld [vmem:[%s4548_s20 + $0x8] sm:$0xff] }
   0x9   :  { %v67_v2 = vsel %vm66_vm0, %v62_v0, 0.0  ;;  %v70_v3 = vsel %vm66_vm0, %v63_v1, 0.0  ;;  %v3566_v5 = vld [vmem:[%s4549_s23] sm:$0xff]   ;;  %v3567_v6 = vld [vmem:[%s4549_s23 + $0x8] sm:$0xff]   ;;  %v3568_v9 = vld [vmem:[%s4549_s23 + $0x10] sm:$0xff]  }
   0xa   :  { %68 = vadd.xlane.f32.xlu0 %v67_v2  ;;  %v168_v7 = vsel %vm66_vm0, %v3566_v5, 0  ;;  %v171_v8 = vsel %vm66_vm0, %v3567_v6, 0  ;;  %v174_v10 = vsel %vm66_vm0, %v3568_v9, 0  ;;  %v3569_v21 = vld [vmem:[%s4549_s23 + $0x18] sm:$0xff]   ;;  %v3570_v23 = vld [vmem:[%s4549_s23 + $0x20] sm:$0xff]   ;;  %v3571_v25 = vld [vmem:[%s4549_s23 + $0x28] sm:$0xff]  }
   0xb   :  { %3239 = vmatpush3.bf16.xpose.msra.mxu0 %v168_v7  ;;  %v177_v22 = vsel %vm66_vm0, %v3569_v21, 0  ;;  %v180_v24 = vsel %vm66_vm0, %v3570_v23, 0  ;;  %v183_v26 = vsel %vm66_vm0, %v3571_v25, 0  ;;  %v3013_v35 = vld [vmem:[%s4550_s22] ss:$0 sm:$0xff]  ;;  %s3693_s22 = smov 16  }
   0xc   :  { %3240 = vmatprep.subr.bf16.mxu0 %v3686_v4  ;;  %v3014_v39 = vld [vmem:[%s4551_s25] ss:$0 sm:$0xff]  ;;  %s3694_s25 = smov 8  }
   0xd   :  { %v110_v21 = vld [vmem:[%s4527_s1] sm:$0x3]  ;;  %s3692_s1 = smov 64  }
   0xe   :  { %71 = vadd.xlane.f32.xlu0 %v70_v3 }
  0x13   :  { %3241 = vmatpush3.bf16.xpose.msra.mxu0 %v171_v8 }
  0x14   :  { %3242 = vmatprep.subr.bf16.mxu0 %v3686_v4 }
  0x1b   :  { %3243 = vmatpush3.bf16.xpose.msra.mxu0 %v174_v10 }
  0x1c   :  { %3244 = vmatprep.subr.bf16.mxu0 %v3686_v4 }
  0x23   :  { %3245 = vmatpush3.bf16.xpose.msra.mxu0 %v177_v22 }
  0x24   :  { %3246 = vmatprep.subr.bf16.mxu0 %v3686_v4 }
  0x2b   :  { %3247 = vmatpush3.bf16.xpose.msra.mxu0 %v180_v24 }
  0x2c   :  { %3248 = vmatprep.subr.bf16.mxu0 %v3686_v4 }
  0x33   :  { %3249 = vmatpush3.bf16.xpose.msra.mxu0 %v183_v26 }
  0x34   :  { %3290 = vmatprep.subr.bf16.mxu0 %v3686_v4 }
  0x97   :  { %v69_v11 = vpop.xlane.xlu0 %68 }
  0x98   :  { %v74_v12 = vmul.f32 0.03125, %v69_v11 }
  0x9a   :  { %v76_v13 = vsub.f32 %v62_v0, %v74_v12 }
  0x9b   :  { %v72_v14 = vpop.xlane.xlu0 %71 }
  0x9c   :  { %v75_v15 = vmul.f32 0.03125, %v72_v14  ;;  %v78_v16 = vmul.f32 %v76_v13, %v76_v13 }
  0x9e   :  { %v77_v17 = vsub.f32 %v63_v1, %v75_v15  ;;  %v80_v18 = vsel %vm66_vm0, %v78_v16, 0.0 }
  0x9f   :  { %81 = vadd.xlane.f32.xlu1 %v80_v18  ;;  %v655_v18 = vlaneseq }
  0xa0   :  { %v79_v19 = vmul.f32 %v77_v17, %v77_v17 }
  0xa2   :  { %v83_v20 = vsel %vm66_vm0, %v79_v19, 0.0  ;;  %v656_v19 = vshrl.u32 %v655_v18, 7 }
  0xa3   :  { %84 = vadd.xlane.f32.xlu1 %v83_v20 }
  0xa4   :  { %v657_v20 = vsub.s32 0, %v656_v19 }
  0xa6   :  { %v3950_v22 = vrot.slane %v110_v21, %v657_v20 }
 0x12c   :  { %v82_v27 = vpop.xlane.xlu1 %81 }
 0x12d   :  { %v86_v28 = vmul.f32 0.03125, %v82_v27 }
 0x12f   :  { %v88_v29 = vadd.f32 1e-12, %v86_v28 }
 0x130   :  { %v85_v30 = vpop.xlane.xlu1 %84 }
 0x131   :  { %3594 = vrsqrt.f32 %v88_v29  ;;  %v87_v31 = vmul.f32 0.03125, %v85_v30 }
 0x133   :  { %v89_v32 = vadd.f32 1e-12, %v87_v31 }
 0x135   :  { %3596 = vrsqrt.f32 %v89_v32 }
 0x13b   :  { %v3595_v33 = vpop.eup %3594 }
 0x13c   :  { %v92_v34 = vmul.f32 %v3595_v33, %v76_v13 }
 0x13e   :  { %v100_v38 = vmul.f32 %v3013_v35, %v92_v34 }
 0x13f   :  { %v3597_v36 = vpop.eup %3596 }
 0x140   :  { %v93_v37 = vmul.f32 %v3597_v36, %v77_v17  ;;  %v3849_v41 = vadd.f32 %v3014_v39, %v100_v38 }
 0x142   :  { %v101_v40 = vmul.f32 %v3013_v35, %v93_v37 }
 0x144   :  { %v3851_v42 = vadd.f32 %v3014_v39, %v101_v40 }
 0x146   :  { %v127_v43 = vpack.c.bf16 %v3851_v42, %v3849_v41 }
 0x148   :  { %3251 = vmatmul.mubr.msk.bf16.vlgmr.msra.gmra.mrb[0].mxu0 %vm66_vm0, %v127_v43 }
 0x149   :  { %3292 = vmatprep.mubr.msk.bf16.mxu0 %vm3687_vm1, %v3686_v4 }
 0x21b   :  { %v219_v45 = vpop.f32.mrb[0].mxu0 }
 0x21c   :  { %v220_v46 = vadd.f32 %v3015_v44, %v219_v45  ;;  %v3252_v47 = vpop.f32.mrb[1].mxu0 }
 0x21d   :  { %v222_v48 = vpop.f32.mrb[2].mxu0 }
 0x21e   :  { %230 = vrot.lane.b32.xlu1 %v220_v46, %s3688_s27  ;;  %227 = vrot.lane.b32.xlu0 %v220_v46, %s3689_s28  ;;  %v3253_v49 = vpop.f32.mrb[3].mxu0  ;;  %v223_v50 = vadd.f32 %v3015_v44, %v222_v48  ;;  %v3865_v51 = vpack.c.bf16 %v220_v46, %v220_v46 }
 0x220   :  { %v3881_v59 = vpack.c.bf16 %v223_v50, %v223_v50 }
 0x222   :  { %233 = vrot.lane.b32.xlu1 %v220_v46, %s3690_s29  ;;  %240 = vrot.lane.b32.xlu0 %v223_v50, %s3688_s27 }
 0x226   :  { %255 = vrot.lane.b32.xlu0 %v3865_v51, %s3691_s0  ;;  %237 = vrot.lane.b32.xlu1 %v223_v50, %s3689_s28 }
 0x22a   :  { %243 = vrot.lane.b32.xlu1 %v223_v50, %s3690_s29 }
 0x290   :  { %v231_v52 = vpop.permute.xlu1 %230  ;;  %v228_v53 = vpop.permute.xlu0 %227 }
 0x291   :  { %v3871_v54 = vpack.c.bf16 %v231_v52, %v231_v52  ;;  %v3873_v55 = vpack.c.bf16 %v228_v53, %v228_v53 }
 0x293   :  { %354 = vrot.lane.b32.xlu0 %v3871_v54, %s3691_s0  ;;  %305 = vrot.lane.b32.xlu1 %v3873_v55, %s3691_s0 }
 0x294   :  { %v234_v56 = vpop.permute.xlu1 %233  ;;  %v241_v57 = vpop.permute.xlu0 %240 }
 0x295   :  { %v3879_v58 = vpack.c.bf16 %v234_v56, %v234_v56  ;;  %v3887_v62 = vpack.c.bf16 %v241_v57, %v241_v57 }
 0x297   :  { %403 = vrot.lane.b32.xlu1 %v3879_v58, %s3691_s0  ;;  %452 = vrot.lane.b32.xlu0 %v3881_v59, %s3691_s0 }
 0x298   :  { %v256_v60 = vpop.permute.xlu0 %255  ;;  %v238_v61 = vpop.permute.xlu1 %237 }
 0x299   :  { %v3889_v63 = vpack.c.bf16 %v238_v61, %v238_v61  ;;  %v262_v0 = vsel %vm257_vm2, %v256_v60, 0 }
 0x29a   :  { %3255 = vmatpush3.bf16.xpose.msra.mxu1 %v262_v0  ;;  %v112_v0 = vrot.slane %v110_v21, 1 }
 0x29b   :  { %501 = vrot.lane.b32.xlu1 %v3889_v63, %s3691_s0  ;;  %550 = vrot.lane.b32.xlu0 %v3887_v62, %s3691_s0 }
 0x29c   :  { %v244_v1 = vpop.permute.xlu1 %243  ;;  %3260 = vmatprep.subr.bf16.mxu1 %v3686_v4 }
 0x29d   :  { %v3897_v2 = vpack.c.bf16 %v244_v1, %v244_v1 }
 0x29f   :  { %599 = vrot.lane.b32.xlu1 %v3897_v2, %s3691_s0 }
 0x2a1   :  { %3257 = vmatmul.mubr.msk.bf16.vlgmr.msra.gmra.mrb[0].mxu1 %vm257_vm2, %v3865_v51 }
 0x2a2   :  { %3262 = vmatprep.mubr.msk.bf16.mxu1 %vm3687_vm1, %v3686_v4 }
 0x305   :  { %v355_v3 = vpop.permute.xlu0 %354  ;;  %v306_v5 = vpop.permute.xlu1 %305 }
 0x306   :  { %v311_v6 = vsel %vm257_vm2, %v306_v5, 0  ;;  %v360_v9 = vsel %vm257_vm2, %v355_v3, 0 }
 0x307   :  { %3261 = vmatpush3.bf16.xpose.msra.mxu1 %v311_v6 }
 0x308   :  { %3266 = vmatprep.subr.bf16.mxu1 %v3686_v4 }
 0x309   :  { %v453_v7 = vpop.permute.xlu0 %452  ;;  %v404_v11 = vpop.permute.xlu1 %403 }
 0x30a   :  { %v409_v12 = vsel %vm257_vm2, %v404_v11, 0  ;;  %v458_v13 = vsel %vm257_vm2, %v453_v7, 0  ;;  %v3971_v7 = vrot.slane %v112_v0, %v657_v20 }
 0x30d   :  { %v551_v8 = vpop.permute.xlu0 %550  ;;  %v502_v14 = vpop.permute.xlu1 %501 }
 0x30e   :  { %v556_v10 = vsel %vm257_vm2, %v551_v8, 0  ;;  %3263 = vmatmul.mubr.msk.bf16.vlgmr.msra.gmra.mrb[4].mxu1 %vm257_vm2, %v3873_v55  ;;  %v507_v15 = vsel %vm257_vm2, %v502_v14, 0 }
 0x30f   :  { %3267 = vmatpush3.bf16.xpose.msra.mxu1 %v360_v9  ;;  %3291 = vmatpush3.bf16.xpose.msra.mxu0 %v556_v10 }
 0x310   :  { %3268 = vmatprep.mubr.msk.bf16.mxu1 %vm3687_vm1, %v3686_v4  ;;  %3272 = vmatprep.subr.bf16.mxu1 %v3686_v4 }
 0x311   :  { %3302 = vmatprep.subr.bf16.mxu0 %v3686_v4  ;;  %v600_v16 = vpop.permute.xlu1 %599 }
 0x312   :  { %v605_v17 = vsel %vm257_vm2, %v600_v16, 0 }
 0x316   :  { %3269 = vmatmul.mubr.msk.bf16.vlgmr.msra.gmra.mrb[8].mxu1 %vm257_vm2, %v3871_v54  ;;  %3293 = vmatmul.mubr.msk.bf16.vlgmr.msra.gmra.mrb[4].mxu0 %vm257_vm2, %v3887_v62 }
 0x317   :  { %3273 = vmatpush3.bf16.xpose.msra.mxu1 %v409_v12  ;;  %3274 = vmatprep.mubr.msk.bf16.mxu1 %vm3687_vm1, %v3686_v4 }
 0x318   :  { %3278 = vmatprep.subr.bf16.mxu1 %v3686_v4  ;;  %3304 = vmatprep.mubr.msk.bf16.mxu0 %vm3687_vm1, %v3686_v4 }
 0x31e   :  { %3275 = vmatmul.mubr.msk.bf16.vlgmr.msra.gmra.mrb[12].mxu1 %vm257_vm2, %v3879_v58 }
 0x31f   :  { %3279 = vmatpush3.bf16.xpose.msra.mxu1 %v458_v13  ;;  %3280 = vmatprep.mubr.msk.bf16.mxu1 %vm3687_vm1, %v3686_v4 }
 0x320   :  { %3284 = vmatprep.subr.bf16.mxu1 %v3686_v4 }
 0x326   :  { %3281 = vmatmul.mubr.msk.bf16.vlgmr.msra.gmra.mrb[16].mxu1 %vm257_vm2, %v3881_v59 }
 0x327   :  { %3285 = vmatpush3.bf16.xpose.msra.mxu1 %v507_v15  ;;  %3286 = vmatprep.mubr.msk.bf16.mxu1 %vm3687_vm1, %v3686_v4 }
 0x328   :  { %3296 = vmatprep.subr.bf16.mxu1 %v3686_v4 }
 0x32e   :  { %3287 = vmatmul.mubr.msk.bf16.vlgmr.msra.gmra.mrb[20].mxu1 %vm257_vm2, %v3889_v63 }
 0x32f   :  { %3297 = vmatpush3.bf16.xpose.msra.mxu1 %v605_v17  ;;  %3298 = vmatprep.mubr.msk.bf16.mxu1 %vm3687_vm1, %v3686_v4 }
 0x330   :  { %3308 = vmatprep.subr.bf16.mxu1 %v3686_v4 }
 0x336   :  { %3299 = vmatmul.mubr.msk.bf16.vlgmr.msra.gmra.mrb[24].mxu1 %vm257_vm2, %v3897_v2 }
 0x337   :  { %3310 = vmatprep.mubr.msk.bf16.mxu1 %vm3687_vm1, %v3686_v4 }
 0x374   :  { %v298_v23 = vpop.f32.mrb[0].mxu1 }
 0x375   :  { %v647_v24 = vmul.f32 0.35355338, %v298_v23  ;;  %v3258_v25 = vpop.f32.mrb[1].mxu1 }
 0x376   :  { %v301_v26 = vpop.f32.mrb[2].mxu1 }
 0x377   :  { %v3259_v27 = vpop.f32.mrb[3].mxu1  ;;  %v3953_v28 = vadd.f32 %v3950_v22, %v647_v24 }
 0x379   :  { %v671_v29 = vsel %vm257_vm2, %v3953_v28, -inf }
 0x37a   :  { %672 = vmax.xlane.f32.xlu0 %v671_v29 }
 0x3e1   :  { %v347_v30 = vpop.f32.mrb[4].mxu1 }
 0x3e2   :  { %v648_v31 = vmul.f32 0.35355338, %v347_v30  ;;  %v3264_v32 = vpop.f32.mrb[5].mxu1 }
 0x3e3   :  { %v350_v33 = vpop.f32.mrb[6].mxu1 }
 0x3e4   :  { %v3265_v34 = vpop.f32.mrb[7].mxu1  ;;  %v3958_v35 = vadd.f32 %v3950_v22, %v648_v31 }
 0x3e6   :  { %v674_v36 = vsel %vm257_vm2, %v3958_v35, -inf }
 0x3e7   :  { %675 = vmax.xlane.f32.xlu1 %v674_v36 }
 0x3e9   :  { %v396_v37 = vpop.f32.mrb[8].mxu1  ;;  %v592_v38 = vpop.f32.mrb[4].mxu0 }
 0x3ea   :  { %v649_v39 = vmul.f32 0.35355338, %v396_v37  ;;  %v3270_v40 = vpop.f32.mrb[9].mxu1  ;;  %v3294_v43 = vpop.f32.mrb[5].mxu0  ;;  %v653_v3 = vmul.f32 0.35355338, %v592_v38 }
 0x3eb   :  { %v399_v44 = vpop.f32.mrb[10].mxu1  ;;  %v595_v45 = vpop.f32.mrb[6].mxu0 }
 0x3ec   :  { %v3271_v46 = vpop.f32.mrb[11].mxu1  ;;  %v3295_v47 = vpop.f32.mrb[7].mxu0  ;;  %v3963_v48 = vadd.f32 %v3950_v22, %v649_v39  ;;  %v669_v12 = vadd.f32 %v3971_v7, %v653_v3 }
 0x3ee   :  { %v677_v49 = vsel %vm257_vm2, %v3963_v48, -inf  ;;  %v689_v14 = vsel %vm257_vm2, %v669_v12, -inf }
 0x3ef   :  { %678 = vmax.xlane.f32.xlu0 %v677_v49 }
 0x3f1   :  { %v445_v50 = vpop.f32.mrb[12].mxu1 }
 0x3f2   :  { %v650_v52 = vmul.f32 0.35355338, %v445_v50  ;;  %v3276_v53 = vpop.f32.mrb[13].mxu1 }
 0x3f3   :  { %v448_v56 = vpop.f32.mrb[14].mxu1 }
 0x3f4   :  { %v3277_v57 = vpop.f32.mrb[15].mxu1  ;;  %v666_v60 = vadd.f32 %v3950_v22, %v650_v52 }
 0x3f6   :  { %v680_v61 = vsel %vm257_vm2, %v666_v60, -inf }
 0x3f7   :  { %681 = vmax.xlane.f32.xlu0 %v680_v61 }
 0x3f8   :  { %816 = vrot.lane.b32.xlu1 %v3873_v55, %s3692_s1 }
 0x3f9   :  { %v494_v1 = vpop.f32.mrb[16].mxu1 }
 0x3fa   :  { %v651_v5 = vmul.f32 0.35355338, %v494_v1  ;;  %v3282_v6 = vpop.f32.mrb[17].mxu1 }
 0x3fb   :  { %v497_v8 = vpop.f32.mrb[18].mxu1 }
 0x3fc   :  { %864 = vrot.lane.b32.xlu1 %v3871_v54, %s3692_s1  ;;  %v3283_v9 = vpop.f32.mrb[19].mxu1  ;;  %v3976_v10 = vadd.f32 %v3971_v7, %v651_v5 }
 0x3fe   :  { %v683_v11 = vsel %vm257_vm2, %v3976_v10, -inf }
 0x3ff   :  { %684 = vmax.xlane.f32.xlu0 %v683_v11 }
 0x401   :  { %v543_v55 = vpop.f32.mrb[20].mxu1 }
 0x402   :  { %v3288_v13 = vpop.f32.mrb[21].mxu1  ;;  %v652_v20 = vmul.f32 0.35355338, %v543_v55 }
 0x403   :  { %v546_v15 = vpop.f32.mrb[22].mxu1  ;;  %690 = vmax.xlane.f32.xlu0 %v689_v14 }
 0x404   :  { %v3289_v16 = vpop.f32.mrb[23].mxu1  ;;  %v3985_v23 = vadd.f32 %v3971_v7, %v652_v20 }
 0x406   :  { %v686_v25 = vsel %vm257_vm2, %v3985_v23, -inf }
 0x407   :  { %v673_v24 = vpop.xlane.xlu0 %672 }
 0x408   :  { %v695_v27 = vsub.f32 %v3953_v28, %v673_v24 }
 0x409   :  { %v641_v17 = vpop.f32.mrb[24].mxu1 }
 0x40a   :  { %v3300_v18 = vpop.f32.mrb[25].mxu1  ;;  %v654_v21 = vmul.f32 0.35355338, %v641_v17  ;;  %v703_v30 = vmul.f32 1.442695, %v695_v27 }
 0x40b   :  { %v644_v54 = vpop.f32.mrb[26].mxu1 }
 0x40c   :  { %v3301_v19 = vpop.f32.mrb[27].mxu1  ;;  %v3990_v26 = vadd.f32 %v3971_v7, %v654_v21  ;;  %3598 = vpow2.f32 %v703_v30 }
 0x40e   :  { %v692_v29 = vsel %vm257_vm2, %v3990_v26, -inf }
 0x419   :  { %767 = vrot.lane.b32.xlu0 %v3865_v51, %s3692_s1  ;;  %v3995_v51 = vpop.eup %3598 }
 0x41a   :  { %v719_v31 = vsel %vm257_vm2, %v3995_v51, 0.0 }
 0x420   :  { %687 = vmax.xlane.f32.xlu1 %v686_v25 }
 0x424   :  { %693 = vmax.xlane.f32.xlu1 %v692_v29 }
 0x435   :  { %912 = vrot.lane.b32.xlu1 %v3879_v58, %s3692_s1 }
 0x438   :  { %720 = vadd.xlane.f32.xlu0 %v719_v31 }
 0x474   :  { %v676_v32 = vpop.xlane.xlu1 %675 }
 0x475   :  { %v696_v33 = vsub.f32 %v3958_v35, %v676_v32 }
 0x477   :  { %v705_v28 = vmul.f32 1.442695, %v696_v33 }
 0x478   :  { %v817_v34 = vpop.permute.xlu1 %816 }
 0x479   :  { %3600 = vpow2.f32 %v705_v28  ;;  %v822_v36 = vsel %vm772_vm3, %v817_v34, 0 }
 0x47a   :  { %3309 = vmatpush3.bf16.msra.mxu1 %v822_v36 }
 0x47b   :  { %3320 = vmatprep.subr.bf16.mxu1 %v3686_v4 }
 0x47c   :  { %v679_v37 = vpop.xlane.xlu0 %678  ;;  %v865_v6 = vpop.permute.xlu1 %864 }
 0x47d   :  { %v697_v44 = vsub.f32 %v3963_v48, %v679_v37 }
 0x47f   :  { %v707_v49 = vmul.f32 1.442695, %v697_v44 }
 0x483   :  { %v4004_v38 = vpop.eup %3600 }
 0x484   :  { %v682_v58 = vpop.xlane.xlu0 %681  ;;  %v722_v39 = vsel %vm257_vm2, %v4004_v38, 0.0 }
 0x485   :  { %v698_v40 = vsub.f32 %v666_v60, %v682_v58  ;;  %723 = vadd.xlane.f32.xlu1 %v722_v39 }
 0x487   :  { %v709_v43 = vmul.f32 1.442695, %v698_v40 }
 0x489   :  { %3602 = vpow2.f32 %v709_v43 }
 0x48c   :  { %v685_v35 = vpop.xlane.xlu0 %684 }
 0x48d   :  { %v699_v50 = vsub.f32 %v3976_v10, %v685_v35 }
 0x48f   :  { %v711_v60 = vmul.f32 1.442695, %v699_v50 }
 0x490   :  { %v691_v45 = vpop.xlane.xlu0 %690 }
 0x491   :  { %v701_v46 = vsub.f32 %v669_v12, %v691_v45 }
 0x493   :  { %v4009_v47 = vpop.eup %3602  ;;  %v715_v52 = vmul.f32 1.442695, %v701_v46 }
 0x494   :  { %v768_v53 = vpop.permute.xlu0 %767  ;;  %v728_v56 = vsel %vm257_vm2, %v4009_v47, 0.0 }
 0x495   :  { %3604 = vpow2.f32 %v715_v52  ;;  %v774_v57 = vsel %vm772_vm3, %v768_v53, 0  ;;  %729 = vadd.xlane.f32.xlu1 %v728_v56 }
 0x496   :  { %3303 = vmatpush3.bf16.msra.mxu0 %v774_v57  ;;  %3606 = vpow2.f32 %v707_v49 }
 0x497   :  { %3314 = vmatprep.subr.bf16.mxu0 %v3686_v4  ;;  %3608 = vpow2.f32 %v711_v60 }
 0x49f   :  { %v4016_v48 = vpop.eup %3604 }
 0x4a0   :  { %v737_v61 = vsel %vm257_vm2, %v4016_v48, 0.0  ;;  %v4020_v0 = vpop.eup %3606 }
 0x4a1   :  { %738 = vadd.xlane.f32.xlu0 %v737_v61  ;;  %v725_v1 = vsel %vm257_vm2, %v4020_v0, 0.0  ;;  %v4024_v3 = vpop.eup %3608 }
 0x4a2   :  { %v731_v5 = vsel %vm257_vm2, %v4024_v3, 0.0 }
 0x4a5   :  { %726 = vadd.xlane.f32.xlu0 %v725_v1 }
 0x4a6   :  { %1008 = vrot.lane.b32.xlu1 %v3889_v63, %s3692_s1 }
 0x4a9   :  { %732 = vadd.xlane.f32.xlu0 %v731_v5 }
 0x4ad   :  { %v688_v8 = vpop.xlane.xlu1 %687 }
 0x4ae   :  { %v700_v9 = vsub.f32 %v3985_v23, %v688_v8 }
 0x4b0   :  { %v713_v11 = vmul.f32 1.442695, %v700_v9 }
 0x4b1   :  { %v694_v10 = vpop.xlane.xlu1 %693 }
 0x4b2   :  { %v702_v12 = vsub.f32 %v3990_v26, %v694_v10  ;;  %3610 = vpow2.f32 %v713_v11 }
 0x4b4   :  { %v717_v55 = vmul.f32 1.442695, %v702_v12 }
 0x4b5   :  { %v913_v54 = vpop.permute.xlu1 %912 }
 0x4b6   :  { %3612 = vpow2.f32 %v717_v55  ;;  %v918_v24 = vsel %vm772_vm3, %v913_v54, 0 }
 0x4bc   :  { %v4036_v13 = vpop.eup %3610 }
 0x4bd   :  { %v734_v14 = vsel %vm257_vm2, %v4036_v13, 0.0 }
 0x4bf   :  { %960 = vrot.lane.b32.xlu0 %v3881_v59, %s3692_s1 }
 0x4c0   :  { %v4040_v15 = vpop.eup %3612 }
 0x4c1   :  { %v740_v16 = vsel %vm257_vm2, %v4040_v15, 0.0 }
 0x4c3   :  { %1056 = vrot.lane.b32.xlu0 %v3887_v62, %s3692_s1  ;;  %v870_v62 = vsel %vm772_vm3, %v865_v6, 0 }
 0x4c5   :  { %v721_v63 = vpop.xlane.xlu0 %720 }
 0x4c6   :  { %3614 = vrcp.f32 %v721_v63 }
 0x4ca   :  { %735 = vadd.xlane.f32.xlu1 %v734_v14 }
 0x4ce   :  { %741 = vadd.xlane.f32.xlu1 %v740_v16  ;;  %v3572_v16 = vld [vmem:[%s4528_s6] sm:$0xff]  }
 0x4d0   :  { %v3615_v17 = vpop.eup %3614 }
 0x4d1   :  { %v751_v59 = vmul.f32 %v3615_v17, %v3995_v51 }
 0x4d3   :  { %v759_v18 = vpack.c.bf16 %v751_v59, %v751_v59 }
 0x4d5   :  { %3305 = vmatmul.mubr.msk.bf16.vlgmr.msra.gmra.mrb[8].mxu0 %vm257_vm2, %v759_v18  ;;  %v1210_v18 = vsel %vm66_vm0, %v3572_v16, 0 }
 0x4d6   :  { %3315 = vmatpush3.bf16.msra.mxu0 %v870_v62  ;;  %3316 = vmatprep.mubr.msk.bf16.mxu0 %vm3687_vm1, %v3686_v4 }
 0x4d7   :  { %3326 = vmatprep.subr.bf16.mxu0 %v3686_v4 }
 0x4df   :  { %1104 = vrot.lane.b32.xlu1 %v3897_v2, %s3692_s1 }
 0x512   :  { %v724_v19 = vpop.xlane.xlu1 %723 }
 0x513   :  { %3616 = vrcp.f32 %v724_v19 }
 0x51d   :  { %v3617_v20 = vpop.eup %3616 }
 0x51e   :  { %v752_v21 = vmul.f32 %v3617_v20, %v4004_v38 }
 0x520   :  { %v760_v23 = vpack.c.bf16 %v752_v21, %v752_v21 }
 0x522   :  { %3311 = vmatmul.mubr.msk.bf16.vlgmr.msra.gmra.mrb[28].mxu1 %vm257_vm2, %v760_v23  ;;  %v730_v25 = vpop.xlane.xlu1 %729 }
 0x523   :  { %3321 = vmatpush3.bf16.msra.mxu1 %v918_v24  ;;  %3618 = vrcp.f32 %v730_v25  ;;  %3322 = vmatprep.mubr.msk.bf16.mxu1 %vm3687_vm1, %v3686_v4  ;;  %v3573_v25 = vld [vmem:[%s4528_s6 + $0x8] sm:$0xff]  }
 0x524   :  { %3332 = vmatprep.subr.bf16.mxu1 %v3686_v4 }
 0x526   :  { %v1009_v29 = vpop.permute.xlu1 %1008 }
 0x527   :  { %v1014_v51 = vsel %vm772_vm3, %v1009_v29, 0 }
 0x52d   :  { %v3619_v2 = vpop.eup %3618 }
 0x52e   :  { %v754_v26 = vmul.f32 %v3619_v2, %v4009_v47  ;;  %v739_v27 = vpop.xlane.xlu0 %738  ;;  %v1213_v2 = vsel %vm66_vm0, %v3573_v25, 0 }
 0x530   :  { %v762_v30 = vpack.c.bf16 %v754_v26, %v754_v26 }
 0x532   :  { %3323 = vmatmul.mubr.msk.bf16.vlgmr.msra.gmra.mrb[32].mxu1 %vm257_vm2, %v762_v30  ;;  %v727_v31 = vpop.xlane.xlu0 %726 }
 0x533   :  { %3333 = vmatpush3.bf16.msra.mxu1 %v1014_v51  ;;  %3620 = vrcp.f32 %v727_v31  ;;  %3334 = vmatprep.mubr.msk.bf16.mxu1 %vm3687_vm1, %v3686_v4 }
 0x534   :  { %3344 = vmatprep.subr.bf16.mxu1 %v3686_v4 }
 0x536   :  { %v733_v32 = vpop.xlane.xlu0 %732 }
 0x537   :  { %3622 = vrcp.f32 %v733_v32 }
 0x538   :  { %3624 = vrcp.f32 %v739_v27 }
 0x53a   :  { %v961_v34 = vpop.permute.xlu0 %960 }
 0x53b   :  { %v966_v38 = vsel %vm772_vm3, %v961_v34, 0 }
 0x53d   :  { %v3621_v33 = vpop.eup %3620 }
 0x53e   :  { %v753_v28 = vmul.f32 %v3621_v33, %v4020_v0  ;;  %v1057_v39 = vpop.permute.xlu0 %1056 }
 0x53f   :  { %v1062_v35 = vsel %vm772_vm3, %v1057_v39, 0 }
 0x540   :  { %v761_v36 = vpack.c.bf16 %v753_v28, %v753_v28 }
 0x541   :  { %v3623_v37 = vpop.eup %3622 }
 0x542   :  { %3317 = vmatmul.mubr.msk.bf16.vlgmr.msra.gmra.mrb[12].mxu0 %vm257_vm2, %v761_v36  ;;  %v755_v58 = vmul.f32 %v3623_v37, %v4024_v3  ;;  %v3625_v43 = vpop.eup %3624 }
 0x543   :  { %3327 = vmatpush3.bf16.msra.mxu0 %v966_v38  ;;  %3328 = vmatprep.mubr.msk.bf16.mxu0 %vm3687_vm1, %v3686_v4  ;;  %v757_v44 = vmul.f32 %v3625_v43, %v4016_v48 }
 0x544   :  { %3338 = vmatprep.subr.bf16.mxu0 %v3686_v4  ;;  %v763_v40 = vpack.c.bf16 %v755_v58, %v755_v58 }
 0x545   :  { %v765_v45 = vpack.c.bf16 %v757_v44, %v757_v44 }
 0x54a   :  { %3329 = vmatmul.mubr.msk.bf16.vlgmr.msra.gmra.mrb[16].mxu0 %vm257_vm2, %v763_v40 }
 0x54b   :  { %3339 = vmatpush3.bf16.msra.mxu0 %v1062_v35  ;;  %3340 = vmatprep.mubr.msk.bf16.mxu0 %vm3687_vm1, %v3686_v4 }
 0x54c   :  { %3350 = vmatprep.subr.bf16.mxu0 %v3686_v4 }
 0x552   :  { %3341 = vmatmul.mubr.msk.bf16.vlgmr.msra.gmra.mrb[20].mxu0 %vm257_vm2, %v765_v45 }
 0x553   :  { %3354 = vmatprep.mubr.msk.bf16.mxu0 %vm3687_vm1, %v3686_v4 }
 0x554   :  { %3351 = vmatpush3.bf16.xpose.msra.mxu0 %v1210_v18  ;;  %v3576_v18 = vld [vmem:[%s4530_s10 + $0x10] sm:$0xff]  }
 0x555   :  { %3352 = vmatprep.subr.bf16.mxu0 %v3686_v4 }
 0x557   :  { %v736_v46 = vpop.xlane.xlu1 %735 }
 0x558   :  { %3626 = vrcp.f32 %v736_v46 }
 0x55b   :  { %v742_v47 = vpop.xlane.xlu1 %741 }
 0x55c   :  { %3628 = vrcp.f32 %v742_v47  ;;  %3353 = vmatpush3.bf16.xpose.msra.mxu0 %v1213_v2 }
 0x55d   :  { %3370 = vmatprep.subr.bf16.mxu0 %v3686_v4 }
 0x55f   :  { %v1105_v52 = vpop.permute.xlu1 %1104 }
 0x560   :  { %v1110_v57 = vsel %vm772_vm3, %v1105_v52, 0 }
 0x562   :  { %v3627_v49 = vpop.eup %3626 }
 0x563   :  { %v756_v50 = vmul.f32 %v3627_v49, %v4036_v13 }
 0x565   :  { %v764_v53 = vpack.c.bf16 %v756_v50, %v756_v50 }
 0x566   :  { %v3629_v56 = vpop.eup %3628 }
 0x567   :  { %3335 = vmatmul.mubr.msk.bf16.vlgmr.msra.gmra.mrb[36].mxu1 %vm257_vm2, %v764_v53  ;;  %v758_v60 = vmul.f32 %v3629_v56, %v4040_v15  ;;  %v3039_v56 = vld [vmem:[%s4529_s7] ss:$0 sm:$0xff] }
 0x568   :  { %3345 = vmatpush3.bf16.msra.mxu1 %v1110_v57  ;;  %3346 = vmatprep.mubr.msk.bf16.mxu1 %vm3687_vm1, %v3686_v4 }
 0x569   :  { %3358 = vmatprep.subr.bf16.mxu1 %v3686_v4  ;;  %v766_v48 = vpack.c.bf16 %v758_v60, %v758_v60 }
 0x56f   :  { %3347 = vmatmul.mubr.msk.bf16.vlgmr.msra.gmra.mrb[40].mxu1 %vm257_vm2, %v766_v48 }
 0x570   :  { %3366 = vmatprep.mubr.msk.bf16.mxu1 %vm3687_vm1, %v3686_v4 }
 0x5a8   :  { %v810_v61 = vpop.f32.mrb[8].mxu0 }
 0x5a9   :  { %v3306_v0 = vpop.f32.mrb[9].mxu0 }
 0x5aa   :  { %v813_v1 = vpop.f32.mrb[10].mxu0 }
 0x5ab   :  { %v3307_v3 = vpop.f32.mrb[11].mxu0 }
 0x5f5   :  { %v858_v5 = vpop.f32.mrb[28].mxu1 }
 0x5f6   :  { %v3312_v6 = vpop.f32.mrb[29].mxu1 }
 0x5f7   :  { %v861_v8 = vpop.f32.mrb[30].mxu1 }
 0x5f8   :  { %v3313_v9 = vpop.f32.mrb[31].mxu1 }
 0x5f9   :  { %v3574_v9 = vld [vmem:[%s4530_s10] sm:$0xff]  }
 0x605   :  { %v954_v10 = vpop.f32.mrb[32].mxu1 }
 0x606   :  { %v3324_v11 = vpop.f32.mrb[33].mxu1 }
 0x607   :  { %v957_v12 = vpop.f32.mrb[34].mxu1 }
 0x608   :  { %v3325_v55 = vpop.f32.mrb[35].mxu1 }
 0x615   :  { %v906_v63 = vpop.f32.mrb[12].mxu0 }
 0x616   :  { %v3318_v13 = vpop.f32.mrb[13].mxu0 }
 0x617   :  { %v909_v14 = vpop.f32.mrb[14].mxu0 }
 0x618   :  { %v3319_v15 = vpop.f32.mrb[15].mxu0 }
 0x61d   :  { %v1002_v17 = vpop.f32.mrb[16].mxu0 }
 0x61e   :  { %v3330_v59 = vpop.f32.mrb[17].mxu0 }
 0x61f   :  { %v1005_v62 = vpop.f32.mrb[18].mxu0 }
 0x620   :  { %v3331_v54 = vpop.f32.mrb[19].mxu0  ;;  %v1348_v62 = vsel %vm66_vm0, %v3576_v18, 0 }
 0x621   :  { %v3577_v54 = vld [vmem:[%s4530_s10 + $0x18] sm:$0xff]  }
 0x625   :  { %v1098_v19 = vpop.f32.mrb[20].mxu0 }
 0x626   :  { %v3540_v20 = vpack.i.bf16 %v1098_v19, %v906_v63  ;;  %v3342_v21 = vpop.f32.mrb[21].mxu0  ;;  %v1351_v19 = vsel %vm66_vm0, %v3577_v54, 0 }
 0x627   :  { %v1101_v23 = vpop.f32.mrb[22].mxu0 }
 0x628   :  { %3541 = vrot.lane.b32.xlu1 %v3540_v20, %s3693_s22  ;;  %v3343_v24 = vpop.f32.mrb[23].mxu0 }
 0x63a   :  { %v1050_v26 = vpop.f32.mrb[36].mxu1 }
 0x63b   :  { %v3535_v27 = vpack.i.bf16 %v1050_v26, %v858_v5  ;;  %v3336_v29 = vpop.f32.mrb[37].mxu1 }
 0x63c   :  { %v1053_v30 = vpop.f32.mrb[38].mxu1  ;;  %v3043_v29 = vld [vmem:[%s4531_s8] ss:$0 sm:$0xff] }
 0x63d   :  { %v3337_v51 = vpop.f32.mrb[39].mxu1  ;;  %3536 = vrot.lane.b32.xlu0 %v3535_v27, %s3694_s25 }
 0x642   :  { %v1146_v31 = vpop.f32.mrb[40].mxu1 }
 0x643   :  { %v3545_v32 = vpack.i.bf16 %v1146_v31, %v954_v10  ;;  %v3348_v33 = vpop.f32.mrb[41].mxu1  ;;  %v1342_v10 = vsel %vm66_vm0, %v3574_v9, 0 }
 0x644   :  { %v1149_v28 = vpop.f32.mrb[42].mxu1  ;;  %3359 = vmatpush3.bf16.xpose.msra.mxu1 %v1342_v10 }
 0x645   :  { %v3349_v34 = vpop.f32.mrb[43].mxu1  ;;  %3546 = vrot.lane.b32.xlu0 %v3545_v32, %s3695_s3  ;;  %3360 = vmatprep.subr.bf16.mxu1 %v3686_v4  ;;  %v3044_v32 = vld [vmem:[%s4532_s9] ss:$0 sm:$0xff] }
 0x69a   :  { %v3542_v58 = vpop.permute.xlu1 %3541 }
 0x69b   :  { %v3544_v43 = vunpack.i.h.bf16 %v3542_v58  ;;  %v3543_v35 = vunpack.i.l.bf16 %v3542_v58  ;;  %v3579_v58 = vld [vmem:[%s4533_s12 + $0x8] sm:$0xff]  }
 0x6af   :  { %v3537_v36 = vpop.permute.xlu0 %3536 }
 0x6b0   :  { %v3539_v37 = vunpack.i.h.bf16 %v3537_v36  ;;  %v3538_v38 = vunpack.i.l.bf16 %v3537_v36 }
 0x6b2   :  { %v1164_v39 = vsel %vm257_vm2, %v810_v61, %v3538_v38  ;;  %v1181_v40 = vsel %vm257_vm2, %v1002_v17, %v3539_v37  ;;  %v3575_v17 = vld [vmem:[%s4530_s10 + $0x8] sm:$0xff]   ;;  %v3578_v37 = vld [vmem:[%s4533_s12] sm:$0xff]  }
 0x6b3   :  { %v1166_v47 = vsel %vm1165_vm4, %v1164_v39, %v3543_v35  ;;  %v1182_v49 = vsel %vm1165_vm4, %v1181_v40, %v3544_v43  ;;  %v1345_v59 = vsel %vm66_vm0, %v3575_v17, 0  ;;  %v1439_v38 = vsel %vm1434_vm6, %v3578_v37, 0  ;;  %v3045_v40 = vld [vmem:[%s4534_s11] ss:$0 sm:$0xff]  ;;  %v3585_v37 = vld [vmem:[%s4549_s23 + $0x58] sm:$0xff]  }
 0x6b4   :  { %3361 = vmatpush3.bf16.xpose.msra.mxu1 %v1345_v59  ;;  %v1442_v39 = vsel %vm1434_vm6, %v3579_v58, 0 }
 0x6b5   :  { %3362 = vmatprep.subr.bf16.mxu1 %v3686_v4 }
 0x6b7   :  { %v3547_v44 = vpop.permute.xlu0 %3546 }
 0x6b8   :  { %v3549_v45 = vunpack.i.h.bf16 %v3547_v44  ;;  %v3548_v46 = vunpack.i.l.bf16 %v3547_v44 }
 0x6ba   :  { %v1168_v50 = vsel %vm1167_vm5, %v1166_v47, %v3548_v46  ;;  %v1183_v52 = vsel %vm1167_vm5, %v1182_v49, %v3549_v45 }
 0x6bb   :  { %v1189_v53 = vpack.c.bf16 %v1183_v52, %v1168_v50 }
 0x6bc   :  { %3363 = vmatpush3.bf16.xpose.msra.mxu1 %v1348_v62  ;;  %v3580_v62 = vld [vmem:[%s4549_s23 + $0x30] sm:$0xff]  }
 0x6bd   :  { %3355 = vmatmul.mubr.msk.bf16.vlgmr.msra.gmra.mrb[24].mxu0 %vm66_vm0, %v1189_v53  ;;  %3364 = vmatprep.subr.bf16.mxu1 %v3686_v4  ;;  %v1587_v54 = vsel %vm66_vm0, %v3580_v62, 0 }
 0x6be   :  { %3374 = vmatprep.mubr.msk.bf16.mxu0 %vm3687_vm1, %v3686_v4  ;;  %3371 = vmatpush3.bf16.xpose.msra.mxu0 %v1439_v38  ;;  %v1602_v38 = vsel %vm66_vm0, %v3585_v37, 0 }
 0x6bf   :  { %3372 = vmatprep.subr.bf16.mxu0 %v3686_v4 }
 0x6c4   :  { %3365 = vmatpush3.bf16.xpose.msra.mxu1 %v1351_v19  ;;  %v3581_v19 = vld [vmem:[%s4549_s23 + $0x38] sm:$0xff]  }
 0x6c5   :  { %3394 = vmatprep.subr.bf16.mxu1 %v3686_v4 }
 0x6c6   :  { %3373 = vmatpush3.bf16.xpose.msra.mxu0 %v1442_v39 }
 0x6c7   :  { %3378 = vmatprep.subr.bf16.mxu0 %v3686_v4 }
 0x790   :  { %v1249_v57 = vpop.f32.mrb[24].mxu0 }
 0x791   :  { %v1250_v60 = vadd.f32 %v3039_v56, %v1249_v57  ;;  %v3356_v48 = vpop.f32.mrb[25].mxu0 }
 0x792   :  { %v1252_v61 = vpop.f32.mrb[26].mxu0 }
 0x793   :  { %v1253_v0 = vadd.f32 %v3039_v56, %v1252_v61  ;;  %v3357_v1 = vpop.f32.mrb[27].mxu0  ;;  %v1256_v3 = vadd.f32 %v1250_v60, %v3849_v41 }
 0x795   :  { %v1260_v5 = vsel %vm66_vm0, %v1256_v3, 0.0  ;;  %v1257_v6 = vadd.f32 %v1253_v0, %v3851_v42 }
 0x796   :  { %1261 = vadd.xlane.f32.xlu1 %v1260_v5 }
 0x797   :  { %v1263_v8 = vsel %vm66_vm0, %v1257_v6, 0.0 }
 0x798   :  { %1264 = vadd.xlane.f32.xlu0 %v1263_v8 }
 0x823   :  { %v1262_v11 = vpop.xlane.xlu1 %1261 }
 0x824   :  { %v1266_v12 = vmul.f32 0.03125, %v1262_v11 }
 0x825   :  { %v1265_v41 = vpop.xlane.xlu0 %1264 }
 0x826   :  { %v1268_v55 = vsub.f32 %v1256_v3, %v1266_v12  ;;  %v1267_v63 = vmul.f32 0.03125, %v1265_v41  ;;  %v3051_v41 = vld [vmem:[%s4535_s13] ss:$0 sm:$0xff] }
 0x828   :  { %v1269_v13 = vsub.f32 %v1257_v6, %v1267_v63  ;;  %v1270_v42 = vmul.f32 %v1268_v55, %v1268_v55 }
 0x82a   :  { %v1272_v14 = vsel %vm66_vm0, %v1270_v42, 0.0  ;;  %v1271_v15 = vmul.f32 %v1269_v13, %v1269_v13 }
 0x82b   :  { %1273 = vadd.xlane.f32.xlu0 %v1272_v14 }
 0x82c   :  { %v1275_v16 = vsel %vm66_vm0, %v1271_v15, 0.0 }
 0x82f   :  { %1276 = vadd.xlane.f32.xlu0 %v1275_v16 }
 0x8b8   :  { %v1274_v20 = vpop.xlane.xlu0 %1273 }
 0x8b9   :  { %v1278_v21 = vmul.f32 0.03125, %v1274_v20  ;;  %v1590_v20 = vsel %vm66_vm0, %v3581_v19, 0 }
 0x8bb   :  { %v1280_v23 = vadd.f32 1e-12, %v1278_v21  ;;  %v3582_v21 = vld [vmem:[%s4549_s23 + $0x40] sm:$0xff]  }
 0x8bc   :  { %v1277_v24 = vpop.xlane.xlu0 %1276 }
 0x8bd   :  { %3630 = vrsqrt.f32 %v1280_v23  ;;  %v1279_v25 = vmul.f32 0.03125, %v1277_v24  ;;  %v1593_v23 = vsel %vm66_vm0, %v3582_v21, 0 }
 0x8bf   :  { %v1281_v2 = vadd.f32 1e-12, %v1279_v25 }
 0x8c1   :  { %3632 = vrsqrt.f32 %v1281_v2 }
 0x8c7   :  { %v3631_v26 = vpop.eup %3630 }
 0x8c8   :  { %v1284_v27 = vmul.f32 %v3631_v26, %v1268_v55 }
 0x8ca   :  { %v1292_v51 = vmul.f32 %v3043_v29, %v1284_v27 }
 0x8cb   :  { %v3633_v30 = vpop.eup %3632 }
 0x8cc   :  { %v1285_v31 = vmul.f32 %v3633_v30, %v1269_v13  ;;  %v1300_v28 = vadd.f32 %v3044_v32, %v1292_v51 }
 0x8ce   :  { %v1293_v33 = vmul.f32 %v3043_v29, %v1285_v31 }
 0x8d0   :  { %v1301_v34 = vadd.f32 %v3044_v32, %v1293_v33  ;;  %v3583_v33 = vld [vmem:[%s4549_s23 + $0x48] sm:$0xff]  }
 0x8d2   :  { %v1311_v36 = vpack.c.bf16 %v1301_v34, %v1300_v28 }
 0x8d4   :  { %3367 = vmatmul.mubr.msk.bf16.vlgmr.msra.gmra.mrb[44].mxu1 %vm66_vm0, %v1311_v36 }
 0x8d5   :  { %3396 = vmatprep.mubr.msk.bf16.mxu1 %vm3687_vm1, %v3686_v4 }
 0x9a7   :  { %v1387_v43 = vpop.f32.mrb[44].mxu1 }
 0x9a8   :  { %v1388_v35 = vadd.f32 %v3045_v40, %v1387_v43  ;;  %v3368_v44 = vpop.f32.mrb[45].mxu1 }
 0x9a9   :  { %v1390_v45 = vpop.f32.mrb[46].mxu1 }
 0x9aa   :  { %v1396_v46 = vmul.f32 0.044715, %v1388_v35  ;;  %v1391_v47 = vadd.f32 %v3045_v40, %v1390_v45  ;;  %v3369_v49 = vpop.f32.mrb[47].mxu1  ;;  %v1394_v6 = vmul.f32 0.5, %v1388_v35 }
 0x9ac   :  { %v1398_v50 = vmul.f32 %v1396_v46, %v1388_v35  ;;  %v1397_v52 = vmul.f32 0.044715, %v1391_v47  ;;  %v1395_v8 = vmul.f32 0.5, %v1391_v47  ;;  %v3055_v46 = vld [vmem:[%s4536_s14] ss:$0 sm:$0xff] }
 0x9ae   :  { %v1400_v53 = vmul.f32 %v1398_v50, %v1388_v35  ;;  %v1399_v56 = vmul.f32 %v1397_v52, %v1391_v47 }
 0x9b0   :  { %v1402_v57 = vadd.f32 %v1400_v53, %v1388_v35  ;;  %v1401_v60 = vmul.f32 %v1399_v56, %v1391_v47  ;;  %v3056_v53 = vld [vmem:[%s4537_s15] ss:$0 sm:$0xff] }
 0x9b2   :  { %v1404_v48 = vmul.f32 0.7978846, %v1402_v57  ;;  %v1403_v61 = vadd.f32 %v1401_v60, %v1391_v47 }
 0x9b4   :  { %3634 = vtanh.f32 %v1404_v48  ;;  %v1405_v0 = vmul.f32 0.7978846, %v1403_v61  ;;  %v3070_v61 = vld [vmem:[%s4526_s5 + $0x1] ss:$0 sm:$0xff] }
 0x9b6   :  { %3636 = vtanh.f32 %v1405_v0 }
 0x9be   :  { %v3635_v1 = vpop.eup %3634 }
 0x9bf   :  { %v1408_v3 = vadd.f32 1.0, %v3635_v1 }
 0x9c0   :  { %v3637_v5 = vpop.eup %3636 }
 0x9c1   :  { %v1409_v9 = vadd.f32 1.0, %v3637_v5  ;;  %v1410_v10 = vmul.f32 %v1408_v3, %v1394_v6 }
 0x9c3   :  { %v1411_v11 = vmul.f32 %v1409_v9, %v1395_v8 }
 0x9c5   :  { %v1417_v12 = vpack.c.bf16 %v1411_v11, %v1410_v10 }
 0x9c7   :  { %3375 = vmatmul.mubr.msk.bf16.vlgmr.msra.gmra.mrb[28].mxu0 %vm1434_vm6, %v1417_v12 }
 0x9c8   :  { %3390 = vmatprep.mubr.msk.bf16.mxu0 %vm3687_vm1, %v3686_v4  ;;  %3379 = vmatpush3.bf16.xpose.msra.mxu0 %v1587_v54 }
 0x9c9   :  { %3380 = vmatprep.subr.bf16.mxu0 %v3686_v4 }
 0x9d0   :  { %3381 = vmatpush3.bf16.xpose.msra.mxu0 %v1590_v20 }
 0x9d1   :  { %3382 = vmatprep.subr.bf16.mxu0 %v3686_v4 }
 0x9d8   :  { %3383 = vmatpush3.bf16.xpose.msra.mxu0 %v1593_v23 }
 0x9d9   :  { %3384 = vmatprep.subr.bf16.mxu0 %v3686_v4 }
 0xa9a   :  { %v1478_v55 = vpop.f32.mrb[28].mxu0 }
 0xa9b   :  { %v1479_v63 = vadd.f32 %v3051_v41, %v1478_v55  ;;  %v3376_v13 = vpop.f32.mrb[29].mxu0 }
 0xa9c   :  { %v1481_v42 = vpop.f32.mrb[30].mxu0 }
 0xa9d   :  { %v1482_v14 = vadd.f32 %v3051_v41, %v1481_v42  ;;  %v3377_v15 = vpop.f32.mrb[31].mxu0  ;;  %v1485_v16 = vadd.f32 %v1479_v63, %v1300_v28  ;;  %v1596_v28 = vsel %vm66_vm0, %v3583_v33, 0 }
 0xa9e   :  { %3385 = vmatpush3.bf16.xpose.msra.mxu0 %v1596_v28 }
 0xa9f   :  { %v1489_v17 = vsel %vm66_vm0, %v1485_v16, 0.0  ;;  %v1486_v59 = vadd.f32 %v1482_v14, %v1301_v34  ;;  %3386 = vmatprep.subr.bf16.mxu0 %v3686_v4  ;;  %v3584_v34 = vld [vmem:[%s4549_s23 + $0x50] sm:$0xff]  }
 0xaa0   :  { %1490 = vadd.xlane.f32.xlu1 %v1489_v17  ;;  %v1599_v36 = vsel %vm66_vm0, %v3584_v34, 0 }
 0xaa1   :  { %v1492_v18 = vsel %vm66_vm0, %v1486_v59, 0.0 }
 0xaa2   :  { %1493 = vadd.xlane.f32.xlu0 %v1492_v18 }
 0xaa6   :  { %3387 = vmatpush3.bf16.xpose.msra.mxu0 %v1599_v36 }
 0xaa7   :  { %3388 = vmatprep.subr.bf16.mxu0 %v3686_v4 }
 0xaae   :  { %3389 = vmatpush3.bf16.xpose.msra.mxu0 %v1602_v38 }
 0xaaf   :  { %3430 = vmatprep.subr.bf16.mxu0 %v3686_v4 }
 0xb2d   :  { %v1491_v24 = vpop.xlane.xlu1 %1490 }
 0xb2e   :  { %v1495_v25 = vmul.f32 0.03125, %v1491_v24 }
 0xb2f   :  { %v1494_v2 = vpop.xlane.xlu0 %1493 }
 0xb30   :  { %v1497_v26 = vsub.f32 %v1485_v16, %v1495_v25  ;;  %v1496_v27 = vmul.f32 0.03125, %v1494_v2 }
 0xb32   :  { %v1498_v29 = vsub.f32 %v1486_v59, %v1496_v27  ;;  %v1499_v30 = vmul.f32 %v1497_v26, %v1497_v26 }
 0xb34   :  { %v1501_v51 = vsel %vm66_vm0, %v1499_v30, 0.0  ;;  %v1500_v31 = vmul.f32 %v1498_v29, %v1498_v29 }
 0xb35   :  { %1502 = vadd.xlane.f32.xlu1 %v1501_v51 }
 0xb36   :  { %v1504_v32 = vsel %vm66_vm0, %v1500_v31, 0.0 }
 0xb37   :  { %1505 = vadd.xlane.f32.xlu0 %v1504_v32 }
 0xbc2   :  { %v1503_v58 = vpop.xlane.xlu1 %1502 }
 0xbc3   :  { %v1507_v39 = vmul.f32 0.03125, %v1503_v58 }
 0xbc4   :  { %v1506_v40 = vpop.xlane.xlu0 %1505 }
 0xbc5   :  { %v1509_v43 = vadd.f32 1e-12, %v1507_v39  ;;  %v1508_v35 = vmul.f32 0.03125, %v1506_v40 }
 0xbc7   :  { %3638 = vrsqrt.f32 %v1509_v43  ;;  %v1510_v44 = vadd.f32 1e-12, %v1508_v35 }
 0xbc9   :  { %3640 = vrsqrt.f32 %v1510_v44 }
 0xbd1   :  { %v3639_v45 = vpop.eup %3638 }
 0xbd2   :  { %v1513_v47 = vmul.f32 %v3639_v45, %v1497_v26 }
 0xbd3   :  { %v3641_v49 = vpop.eup %3640 }
 0xbd4   :  { %v1521_v50 = vmul.f32 %v3055_v46, %v1513_v47  ;;  %v1514_v52 = vmul.f32 %v3641_v49, %v1498_v29 }
 0xbd6   :  { %v1522_v56 = vmul.f32 %v3055_v46, %v1514_v52  ;;  %v4209_v57 = vadd.f32 %v3056_v53, %v1521_v50 }
 0xbd8   :  { %v4211_v60 = vadd.f32 %v3056_v53, %v1522_v56 }
 0xbda   :  { %v1546_v48 = vpack.c.bf16 %v4211_v60, %v4209_v57 }
 0xbdc   :  { %3391 = vmatmul.mubr.msk.bf16.vlgmr.msra.gmra.mrb[32].mxu0 %vm66_vm0, %v1546_v48 }
 0xbdd   :  { %3432 = vmatprep.mubr.msk.bf16.mxu0 %vm3687_vm1, %v3686_v4 }
 0xcaf   :  { %v1638_v0 = vpop.f32.mrb[32].mxu0 }
 0xcb0   :  { %v1639_v1 = vadd.f32 %v3070_v61, %v1638_v0  ;;  %v3392_v3 = vpop.f32.mrb[33].mxu0 }
 0xcb1   :  { %v1641_v5 = vpop.f32.mrb[34].mxu0 }
 0xcb2   :  { %1649 = vrot.lane.b32.xlu0 %v1639_v1, %s3688_s27  ;;  %1646 = vrot.lane.b32.xlu1 %v1639_v1, %s3689_s28  ;;  %v3393_v6 = vpop.f32.mrb[35].mxu0  ;;  %v1642_v8 = vadd.f32 %v3070_v61, %v1641_v5  ;;  %v1665_v9 = vpack.c.bf16 %v1639_v1, %v1639_v1 }
 0xcb4   :  { %v4238_v13 = vpack.c.bf16 %v1642_v8, %v1642_v8 }
 0xcb6   :  { %1652 = vrot.lane.b32.xlu1 %v1639_v1, %s3690_s29  ;;  %1662 = vrot.lane.b32.xlu0 %v1642_v8, %s3690_s29 }
 0xcba   :  { %1656 = vrot.lane.b32.xlu1 %v1642_v8, %s3689_s28 }
 0xcbe   :  { %1659 = vrot.lane.b32.xlu1 %v1642_v8, %s3688_s27 }
 0xcc2   :  { %1674 = vrot.lane.b32.xlu1 %v1665_v9, %s3691_s0 }
 0xd24   :  { %v1650_v10 = vpop.permute.xlu0 %1649  ;;  %v1647_v11 = vpop.permute.xlu1 %1646 }
 0xd25   :  { %v4228_v12 = vpack.c.bf16 %v1650_v10, %v1650_v10  ;;  %v4230_v41 = vpack.c.bf16 %v1647_v11, %v1647_v11 }
 0xd27   :  { %1723 = vrot.lane.b32.xlu0 %v4230_v41, %s3691_s0  ;;  %1772 = vrot.lane.b32.xlu1 %v4228_v12, %s3691_s0 }
 0xd28   :  { %v1653_v55 = vpop.permute.xlu1 %1652  ;;  %v1663_v15 = vpop.permute.xlu0 %1662 }
 0xd29   :  { %v4236_v63 = vpack.c.bf16 %v1653_v55, %v1653_v55  ;;  %v4248_v17 = vpack.c.bf16 %v1663_v15, %v1663_v15 }
 0xd2b   :  { %1821 = vrot.lane.b32.xlu0 %v4236_v63, %s3691_s0  ;;  %1870 = vrot.lane.b32.xlu1 %v4238_v13, %s3691_s0 }
 0xd2c   :  { %v1657_v42 = vpop.permute.xlu1 %1656 }
 0xd2d   :  { %v4244_v14 = vpack.c.bf16 %v1657_v42, %v1657_v42 }
 0xd2f   :  { %1919 = vrot.lane.b32.xlu0 %v4244_v14, %s3691_s0 }
 0xd30   :  { %v1660_v16 = vpop.permute.xlu1 %1659 }
 0xd31   :  { %v4250_v59 = vpack.c.bf16 %v1660_v16, %v1660_v16 }
 0xd33   :  { %2017 = vrot.lane.b32.xlu0 %v4248_v17, %s3691_s0  ;;  %1968 = vrot.lane.b32.xlu1 %v4250_v59, %s3691_s0 }
 0xd34   :  { %v1675_v18 = vpop.permute.xlu1 %1674 }
 0xd35   :  { %v1680_v62 = vsel %vm257_vm2, %v1675_v18, 0 }
 0xd36   :  { %3395 = vmatpush3.bf16.xpose.msra.mxu1 %v1680_v62 }
 0xd37   :  { %2177 = vrot.lane.b32.xlu1 %v1665_v9, %s3692_s1  ;;  %3400 = vmatprep.subr.bf16.mxu1 %v3686_v4 }
 0xd3d   :  { %3397 = vmatmul.mubr.msk.bf16.vlgmr.msra.gmra.mrb[48].mxu1 %vm257_vm2, %v1665_v9 }
 0xd3e   :  { %3402 = vmatprep.mubr.msk.bf16.mxu1 %vm3687_vm1, %v3686_v4 }
 0xd99   :  { %v1724_v54 = vpop.permute.xlu0 %1723  ;;  %v1773_v20 = vpop.permute.xlu1 %1772 }
 0xd9a   :  { %v1729_v19 = vsel %vm257_vm2, %v1724_v54, 0  ;;  %v1778_v23 = vsel %vm257_vm2, %v1773_v20, 0 }
 0xd9b   :  { %3401 = vmatpush3.bf16.xpose.msra.mxu1 %v1729_v19 }
 0xd9c   :  { %3406 = vmatprep.subr.bf16.mxu1 %v3686_v4 }
 0xd9d   :  { %v1871_v21 = vpop.permute.xlu1 %1870  ;;  %v1822_v2 = vpop.permute.xlu0 %1821 }
 0xd9e   :  { %v1827_v26 = vsel %vm257_vm2, %v1822_v2, 0  ;;  %v1876_v30 = vsel %vm257_vm2, %v1871_v21, 0 }
 0xda1   :  { %v1920_v51 = vpop.permute.xlu0 %1919 }
 0xda2   :  { %3403 = vmatmul.mubr.msk.bf16.vlgmr.msra.gmra.mrb[52].mxu1 %vm257_vm2, %v4230_v41  ;;  %v1925_v31 = vsel %vm257_vm2, %v1920_v51, 0 }
 0xda3   :  { %3407 = vmatpush3.bf16.xpose.msra.mxu1 %v1778_v23  ;;  %3408 = vmatprep.mubr.msk.bf16.mxu1 %vm3687_vm1, %v3686_v4 }
 0xda4   :  { %3412 = vmatprep.subr.bf16.mxu1 %v3686_v4 }
 0xda5   :  { %v1969_v24 = vpop.permute.xlu1 %1968  ;;  %v2018_v32 = vpop.permute.xlu0 %2017 }
 0xda6   :  { %v1974_v25 = vsel %vm257_vm2, %v1969_v24, 0  ;;  %v2023_v33 = vsel %vm257_vm2, %v2018_v32, 0 }
 0xda7   :  { %3431 = vmatpush3.bf16.xpose.msra.mxu0 %v1974_v25 }
 0xda8   :  { %3442 = vmatprep.subr.bf16.mxu0 %v3686_v4 }
 0xda9   :  { %v2178_v27 = vpop.permute.xlu1 %2177 }
 0xdaa   :  { %3409 = vmatmul.mubr.msk.bf16.vlgmr.msra.gmra.mrb[56].mxu1 %vm257_vm2, %v4228_v12  ;;  %v2183_v29 = vsel %vm772_vm3, %v2178_v27, 0 }
 0xdab   :  { %3413 = vmatpush3.bf16.xpose.msra.mxu1 %v1827_v26  ;;  %3414 = vmatprep.mubr.msk.bf16.mxu1 %vm3687_vm1, %v3686_v4 }
 0xdac   :  { %3418 = vmatprep.subr.bf16.mxu1 %v3686_v4 }
 0xdae   :  { %3433 = vmatmul.mubr.msk.bf16.vlgmr.msra.gmra.mrb[36].mxu0 %vm257_vm2, %v4250_v59 }
 0xdaf   :  { %3443 = vmatpush3.bf16.msra.mxu0 %v2183_v29  ;;  %3444 = vmatprep.mubr.msk.bf16.mxu0 %vm3687_vm1, %v3686_v4 }
 0xdb0   :  { %3454 = vmatprep.subr.bf16.mxu0 %v3686_v4 }
 0xdb2   :  { %3415 = vmatmul.mubr.msk.bf16.vlgmr.msra.gmra.mrb[60].mxu1 %vm257_vm2, %v4236_v63 }
 0xdb3   :  { %3419 = vmatpush3.bf16.xpose.msra.mxu1 %v1876_v30  ;;  %3420 = vmatprep.mubr.msk.bf16.mxu1 %vm3687_vm1, %v3686_v4 }
 0xdb4   :  { %3424 = vmatprep.subr.bf16.mxu1 %v3686_v4 }
 0xdba   :  { %3421 = vmatmul.mubr.msk.bf16.vlgmr.msra.gmra.mrb[64].mxu1 %vm257_vm2, %v4238_v13 }
 0xdbb   :  { %3425 = vmatpush3.bf16.xpose.msra.mxu1 %v1925_v31  ;;  %3426 = vmatprep.mubr.msk.bf16.mxu1 %vm3687_vm1, %v3686_v4 }
 0xdbc   :  { %3436 = vmatprep.subr.bf16.mxu1 %v3686_v4 }
 0xdc2   :  { %3427 = vmatmul.mubr.msk.bf16.vlgmr.msra.gmra.mrb[68].mxu1 %vm257_vm2, %v4244_v14 }
 0xdc3   :  { %3437 = vmatpush3.bf16.xpose.msra.mxu1 %v2023_v33  ;;  %3438 = vmatprep.mubr.msk.bf16.mxu1 %vm3687_vm1, %v3686_v4 }
 0xdc4   :  { %3448 = vmatprep.subr.bf16.mxu1 %v3686_v4 }
 0xdca   :  { %3439 = vmatmul.mubr.msk.bf16.vlgmr.msra.gmra.mrb[72].mxu1 %vm257_vm2, %v4248_v17 }
 0xdcb   :  { %3450 = vmatprep.mubr.msk.bf16.mxu1 %vm3687_vm1, %v3686_v4 }
 0xe10   :  { %v1716_v28 = vpop.f32.mrb[48].mxu1 }
 0xe11   :  { %v2065_v34 = vmul.f32 0.35355338, %v1716_v28  ;;  %v3398_v36 = vpop.f32.mrb[49].mxu1 }
 0xe12   :  { %v1719_v37 = vpop.f32.mrb[50].mxu1 }
 0xe13   :  { %v3399_v38 = vpop.f32.mrb[51].mxu1  ;;  %v4307_v58 = vadd.f32 %v2065_v34, %v3950_v22 }
 0xe15   :  { %v2081_v39 = vsel %vm257_vm2, %v4307_v58, -inf }
 0xe16   :  { %2082 = vmax.xlane.f32.xlu1 %v2081_v39 }
 0xe75   :  { %v1765_v40 = vpop.f32.mrb[52].mxu1 }
 0xe76   :  { %v2066_v43 = vmul.f32 0.35355338, %v1765_v40  ;;  %v3404_v35 = vpop.f32.mrb[53].mxu1 }
 0xe77   :  { %v1768_v44 = vpop.f32.mrb[54].mxu1 }
 0xe78   :  { %v3405_v45 = vpop.f32.mrb[55].mxu1  ;;  %v4312_v46 = vadd.f32 %v2066_v43, %v3950_v22 }
 0xe7a   :  { %v2084_v47 = vsel %vm257_vm2, %v4312_v46, -inf }
 0xe7b   :  { %2085 = vmax.xlane.f32.xlu0 %v2084_v47 }
 0xe7d   :  { %v1814_v49 = vpop.f32.mrb[56].mxu1 }
 0xe7e   :  { %v2067_v50 = vmul.f32 0.35355338, %v1814_v49  ;;  %v3410_v52 = vpop.f32.mrb[57].mxu1 }
 0xe7f   :  { %v1817_v53 = vpop.f32.mrb[58].mxu1 }
 0xe80   :  { %v3411_v56 = vpop.f32.mrb[59].mxu1  ;;  %v2075_v48 = vadd.f32 %v2067_v50, %v3950_v22 }
 0xe81   :  { %v2010_v61 = vpop.f32.mrb[36].mxu0 }
 0xe82   :  { %v2071_v0 = vmul.f32 0.35355338, %v2010_v61  ;;  %v3434_v1 = vpop.f32.mrb[37].mxu0  ;;  %v2087_v3 = vsel %vm257_vm2, %v2075_v48, -inf }
 0xe83   :  { %2088 = vmax.xlane.f32.xlu0 %v2087_v3  ;;  %v2013_v5 = vpop.f32.mrb[38].mxu0 }
 0xe84   :  { %v3435_v6 = vpop.f32.mrb[39].mxu0  ;;  %v2079_v8 = vadd.f32 %v2071_v0, %v3971_v7 }
 0xe85   :  { %v1863_v9 = vpop.f32.mrb[60].mxu1 }
 0xe86   :  { %v2068_v10 = vmul.f32 0.35355338, %v1863_v9  ;;  %v3416_v11 = vpop.f32.mrb[61].mxu1  ;;  %v2099_v55 = vsel %vm257_vm2, %v2079_v8, -inf }
 0xe87   :  { %v1866_v42 = vpop.f32.mrb[62].mxu1  ;;  %2100 = vmax.xlane.f32.xlu1 %v2099_v55 }
 0xe88   :  { %v3417_v15 = vpop.f32.mrb[63].mxu1  ;;  %v2076_v16 = vadd.f32 %v2068_v10, %v3950_v22 }
 0xe8a   :  { %v2090_v18 = vsel %vm257_vm2, %v2076_v16, -inf }
 0xe8b   :  { %2091 = vmax.xlane.f32.xlu0 %v2090_v18 }
 0xe8d   :  { %v1912_v62 = vpop.f32.mrb[64].mxu1 }
 0xe8e   :  { %v2069_v54 = vmul.f32 0.35355338, %v1912_v62  ;;  %v3422_v19 = vpop.f32.mrb[65].mxu1 }
 0xe8f   :  { %v1915_v20 = vpop.f32.mrb[66].mxu1 }
 0xe90   :  { %v3423_v21 = vpop.f32.mrb[67].mxu1  ;;  %v4323_v23 = vadd.f32 %v2069_v54, %v3971_v7 }
 0xe92   :  { %v2093_v24 = vsel %vm257_vm2, %v4323_v23, -inf }
 0xe93   :  { %2094 = vmax.xlane.f32.xlu1 %v2093_v24 }
 0xe95   :  { %v1961_v25 = vpop.f32.mrb[68].mxu1 }
 0xe96   :  { %v2070_v2 = vmul.f32 0.35355338, %v1961_v25  ;;  %v3428_v26 = vpop.f32.mrb[69].mxu1 }
 0xe97   :  { %v1964_v27 = vpop.f32.mrb[70].mxu1 }
 0xe98   :  { %v3429_v22 = vpop.f32.mrb[71].mxu1  ;;  %v2078_v29 = vadd.f32 %v2070_v2, %v3971_v7 }
 0xe9a   :  { %v2096_v30 = vsel %vm257_vm2, %v2078_v29, -inf }
 0xe9b   :  { %2097 = vmax.xlane.f32.xlu0 %v2096_v30 }
 0xe9d   :  { %v2059_v51 = vpop.f32.mrb[72].mxu1 }
 0xe9e   :  { %v2072_v31 = vmul.f32 0.35355338, %v2059_v51  ;;  %v3440_v32 = vpop.f32.mrb[73].mxu1 }
 0xe9f   :  { %v2062_v33 = vpop.f32.mrb[74].mxu1 }
 0xea0   :  { %v3441_v28 = vpop.f32.mrb[75].mxu1  ;;  %v2080_v34 = vadd.f32 %v2072_v31, %v3971_v7 }
 0xea2   :  { %v2102_v36 = vsel %vm257_vm2, %v2080_v34, -inf }
 0xea3   :  { %2103 = vmax.xlane.f32.xlu0 %v2102_v36  ;;  %v2083_v37 = vpop.xlane.xlu1 %2082 }
 0xea4   :  { %2273 = vrot.lane.b32.xlu1 %v4228_v12, %s3692_s1  ;;  %v2105_v38 = vsub.f32 %v4307_v58, %v2083_v37 }
 0xea6   :  { %v2113_v39 = vmul.f32 1.442695, %v2105_v38 }
 0xea8   :  { %2321 = vrot.lane.b32.xlu1 %v4236_v63, %s3692_s1  ;;  %3642 = vpow2.f32 %v2113_v39 }
 0xeb2   :  { %v4338_v40 = vpop.eup %3642 }
 0xeb3   :  { %v2129_v7 = vsel %vm257_vm2, %v4338_v40, 0.0 }
 0xeb9   :  { %2225 = vrot.lane.b32.xlu0 %v4230_v41, %s3692_s1 }
 0xecc   :  { %2130 = vadd.xlane.f32.xlu1 %v2129_v7 }
 0xf08   :  { %v2086_v43 = vpop.xlane.xlu0 %2085 }
 0xf09   :  { %v2106_v12 = vsub.f32 %v4312_v46, %v2086_v43 }
 0xf0b   :  { %v2115_v35 = vmul.f32 1.442695, %v2106_v12 }
 0xf0d   :  { %3644 = vpow2.f32 %v2115_v35 }
 0xf10   :  { %v2089_v63 = vpop.xlane.xlu0 %2088 }
 0xf11   :  { %v2107_v44 = vsub.f32 %v2075_v48, %v2089_v63 }
 0xf13   :  { %v2117_v41 = vmul.f32 1.442695, %v2107_v44 }
 0xf14   :  { %v2101_v45 = vpop.xlane.xlu1 %2100 }
 0xf15   :  { %v2111_v58 = vsub.f32 %v2079_v8, %v2101_v45 }
 0xf17   :  { %v4343_v47 = vpop.eup %3644  ;;  %v2125_v49 = vmul.f32 1.442695, %v2111_v58 }
 0xf18   :  { %v2092_v50 = vpop.xlane.xlu0 %2091  ;;  %v2132_v52 = vsel %vm257_vm2, %v4343_v47, 0.0 }
 0xf19   :  { %3646 = vpow2.f32 %v2125_v49  ;;  %v2108_v53 = vsub.f32 %v2076_v16, %v2092_v50  ;;  %2133 = vadd.xlane.f32.xlu0 %v2132_v52 }
 0xf1a   :  { %3648 = vpow2.f32 %v2117_v41 }
 0xf1b   :  { %v2119_v56 = vmul.f32 1.442695, %v2108_v53 }
 0xf1d   :  { %3650 = vpow2.f32 %v2119_v56 }
 0xf20   :  { %v2095_v10 = vpop.xlane.xlu1 %2094 }
 0xf21   :  { %v2109_v11 = vsub.f32 %v4323_v23, %v2095_v10  ;;  %v3586_v10 = vld [vmem:[%s4528_s6 + $0x10] sm:$0xff]  }
 0xf23   :  { %v4347_v46 = vpop.eup %3646  ;;  %v2121_v42 = vmul.f32 1.442695, %v2109_v11  ;;  %v2619_v11 = vsel %vm66_vm0, %v3586_v10, 0 }
 0xf24   :  { %v2147_v48 = vsel %vm257_vm2, %v4347_v46, 0.0  ;;  %v4351_v61 = vpop.eup %3648  ;;  %v2274_v18 = vpop.permute.xlu1 %2273 }
 0xf25   :  { %2148 = vadd.xlane.f32.xlu1 %v2147_v48  ;;  %v2135_v3 = vsel %vm257_vm2, %v4351_v61, 0.0  ;;  %3652 = vpow2.f32 %v2121_v42  ;;  %v2279_v27 = vsel %vm772_vm3, %v2274_v18, 0 }
 0xf27   :  { %v4353_v0 = vpop.eup %3650 }
 0xf28   :  { %v2138_v1 = vsel %vm257_vm2, %v4353_v0, 0.0  ;;  %v2098_v5 = vpop.xlane.xlu0 %2097  ;;  %v2322_v54 = vpop.permute.xlu1 %2321 }
 0xf29   :  { %2139 = vadd.xlane.f32.xlu0 %v2138_v1  ;;  %2136 = vadd.xlane.f32.xlu1 %v2135_v3  ;;  %v2110_v55 = vsub.f32 %v2078_v29, %v2098_v5  ;;  %v2327_v32 = vsel %vm772_vm3, %v2322_v54, 0 }
 0xf2b   :  { %v2123_v15 = vmul.f32 1.442695, %v2110_v55 }
 0xf2d   :  { %3654 = vpow2.f32 %v2123_v15 }
 0xf2f   :  { %v4366_v19 = vpop.eup %3652 }
 0xf30   :  { %v2104_v6 = vpop.xlane.xlu0 %2103  ;;  %v2141_v21 = vsel %vm257_vm2, %v4366_v19, 0.0 }
 0xf31   :  { %v2112_v16 = vsub.f32 %v2080_v34, %v2104_v6 }
 0xf33   :  { %v2127_v62 = vmul.f32 1.442695, %v2112_v16 }
 0xf34   :  { %v2226_v8 = vpop.permute.xlu0 %2225 }
 0xf35   :  { %v2231_v9 = vsel %vm772_vm3, %v2226_v8, 0  ;;  %3656 = vpow2.f32 %v2127_v62 }
 0xf36   :  { %3449 = vmatpush3.bf16.msra.mxu1 %v2231_v9 }
 0xf37   :  { %3460 = vmatprep.subr.bf16.mxu1 %v3686_v4 }
 0xf3a   :  { %2369 = vrot.lane.b32.xlu1 %v4238_v13, %s3692_s1  ;;  %v3655_v13 = vpop.eup %3654 }
 0xf3f   :  { %2417 = vrot.lane.b32.xlu0 %v4244_v14, %s3692_s1  ;;  %v2144_v14 = vsel %vm257_vm2, %v3655_v13, 0.0  ;;  %v4371_v23 = vpop.eup %3656 }
 0xf40   :  { %v2150_v24 = vsel %vm257_vm2, %v4371_v23, 0.0 }
 0xf59   :  { %v2131_v20 = vpop.xlane.xlu1 %2130 }
 0xf5a   :  { %3658 = vrcp.f32 %v2131_v20 }
 0xf5e   :  { %2145 = vadd.xlane.f32.xlu0 %v2144_v14  ;;  %2142 = vadd.xlane.f32.xlu1 %v2141_v21 }
 0xf62   :  { %2151 = vadd.xlane.f32.xlu0 %v2150_v24 }
 0xf64   :  { %v3659_v25 = vpop.eup %3658 }
 0xf65   :  { %v2161_v2 = vmul.f32 %v3659_v25, %v4338_v40 }
 0xf67   :  { %v2169_v26 = vpack.c.bf16 %v2161_v2, %v2161_v2 }
 0xf69   :  { %3445 = vmatmul.mubr.msk.bf16.vlgmr.msra.gmra.mrb[40].mxu0 %vm257_vm2, %v2169_v26 }
 0xf6a   :  { %3455 = vmatpush3.bf16.msra.mxu0 %v2279_v27  ;;  %3456 = vmatprep.mubr.msk.bf16.mxu0 %vm3687_vm1, %v3686_v4 }
 0xf6b   :  { %3466 = vmatprep.subr.bf16.mxu0 %v3686_v4 }
 0xf6f   :  { %2465 = vrot.lane.b32.xlu1 %v4250_v59, %s3692_s1 }
 0xf78   :  { %2513 = vrot.lane.b32.xlu0 %v4248_v17, %s3692_s1 }
 0xfa6   :  { %v2134_v22 = vpop.xlane.xlu0 %2133 }
 0xfa7   :  { %3660 = vrcp.f32 %v2134_v22 }
 0xfb1   :  { %v3661_v29 = vpop.eup %3660 }
 0xfb2   :  { %v2162_v30 = vmul.f32 %v3661_v29, %v4343_v47  ;;  %v2149_v51 = vpop.xlane.xlu1 %2148 }
 0xfb4   :  { %v2170_v31 = vpack.c.bf16 %v2162_v30, %v2162_v30 }
 0xfb6   :  { %3451 = vmatmul.mubr.msk.bf16.vlgmr.msra.gmra.mrb[76].mxu1 %vm257_vm2, %v2170_v31  ;;  %v2140_v33 = vpop.xlane.xlu0 %2139  ;;  %v2137_v28 = vpop.xlane.xlu1 %2136 }
 0xfb7   :  { %3662 = vrcp.f32 %v2140_v33  ;;  %3461 = vmatpush3.bf16.msra.mxu1 %v2327_v32  ;;  %3462 = vmatprep.mubr.msk.bf16.mxu1 %vm3687_vm1, %v3686_v4 }
 0xfb8   :  { %3664 = vrcp.f32 %v2137_v28  ;;  %3472 = vmatprep.subr.bf16.mxu1 %v3686_v4 }
 0xfba   :  { %v2418_v37 = vpop.permute.xlu0 %2417  ;;  %v2370_v38 = vpop.permute.xlu1 %2369 }
 0xfbb   :  { %v2423_v7 = vsel %vm772_vm3, %v2418_v37, 0  ;;  %v2375_v43 = vsel %vm772_vm3, %v2370_v38, 0 }
 0xfc1   :  { %v3663_v17 = vpop.eup %3662 }
 0xfc2   :  { %v3665_v59 = vpop.eup %3664  ;;  %v2164_v34 = vmul.f32 %v3663_v17, %v4353_v0 }
 0xfc3   :  { %v2163_v36 = vmul.f32 %v3665_v59, %v4351_v61 }
 0xfc4   :  { %v2172_v39 = vpack.c.bf16 %v2164_v34, %v2164_v34 }
 0xfc5   :  { %v2171_v40 = vpack.c.bf16 %v2163_v36, %v2163_v36 }
 0xfc6   :  { %3463 = vmatmul.mubr.msk.bf16.vlgmr.msra.gmra.mrb[80].mxu1 %vm257_vm2, %v2172_v39 }
 0xfc7   :  { %3457 = vmatmul.mubr.msk.bf16.vlgmr.msra.gmra.mrb[44].mxu0 %vm257_vm2, %v2171_v40  ;;  %3473 = vmatpush3.bf16.msra.mxu1 %v2423_v7 }
 0xfc8   :  { %3467 = vmatpush3.bf16.msra.mxu0 %v2375_v43  ;;  %3468 = vmatprep.mubr.msk.bf16.mxu0 %vm3687_vm1, %v3686_v4 }
 0xfc9   :  { %3474 = vmatprep.mubr.msk.bf16.mxu1 %vm3687_vm1, %v3686_v4  ;;  %3478 = vmatprep.subr.bf16.mxu0 %v3686_v4 }
 0xfca   :  { %3484 = vmatprep.subr.bf16.mxu1 %v3686_v4 }
 0xfeb   :  { %v2146_v12 = vpop.xlane.xlu0 %2145  ;;  %v2143_v35 = vpop.xlane.xlu1 %2142 }
 0xfec   :  { %3666 = vrcp.f32 %v2146_v12 }
 0xfed   :  { %3668 = vrcp.f32 %v2143_v35 }
 0xfef   :  { %v2152_v63 = vpop.xlane.xlu0 %2151  ;;  %v2466_v49 = vpop.permute.xlu1 %2465 }
 0xff0   :  { %3670 = vrcp.f32 %v2152_v63  ;;  %v2471_v61 = vsel %vm772_vm3, %v2466_v49, 0 }
 0xff1   :  { %3672 = vrcp.f32 %v2149_v51 }
 0xff3   :  { %v2514_v41 = vpop.permute.xlu0 %2513 }
 0xff4   :  { %v2519_v48 = vsel %vm772_vm3, %v2514_v41, 0 }
 0xff6   :  { %v3667_v44 = vpop.eup %3666 }
 0xff7   :  { %v3669_v45 = vpop.eup %3668  ;;  %v2166_v58 = vmul.f32 %v3667_v44, %v3655_v13 }
 0xff8   :  { %v2165_v47 = vmul.f32 %v3669_v45, %v4366_v19 }
 0xff9   :  { %v2174_v50 = vpack.c.bf16 %v2166_v58, %v2166_v58 }
 0xffa   :  { %v3671_v52 = vpop.eup %3670  ;;  %v2173_v53 = vpack.c.bf16 %v2165_v47, %v2165_v47 }
 0xffb   :  { %v3673_v56 = vpop.eup %3672  ;;  %3475 = vmatmul.mubr.msk.bf16.vlgmr.msra.gmra.mrb[84].mxu1 %vm257_vm2, %v2174_v50  ;;  %v2168_v0 = vmul.f32 %v3671_v52, %v4371_v23  ;;  %v3587_v23 = vld [vmem:[%s4528_s6 + $0x18] sm:$0xff]  }
 0xffc   :  { %3469 = vmatmul.mubr.msk.bf16.vlgmr.msra.gmra.mrb[48].mxu0 %vm257_vm2, %v2173_v53  ;;  %3485 = vmatpush3.bf16.msra.mxu1 %v2519_v48  ;;  %v2167_v1 = vmul.f32 %v3673_v56, %v4347_v46  ;;  %v2622_v24 = vsel %vm66_vm0, %v3587_v23, 0  ;;  %v3099_v48 = vld [vmem:[%s4529_s7 + $0x1] ss:$0 sm:$0xff] }
 0xffd   :  { %3479 = vmatpush3.bf16.msra.mxu0 %v2471_v61  ;;  %3480 = vmatprep.mubr.msk.bf16.mxu0 %vm3687_vm1, %v3686_v4  ;;  %v2176_v3 = vpack.c.bf16 %v2168_v0, %v2168_v0 }
 0xffe   :  { %3486 = vmatprep.mubr.msk.bf16.mxu1 %vm3687_vm1, %v3686_v4  ;;  %3490 = vmatprep.subr.bf16.mxu0 %v3686_v4  ;;  %v2175_v5 = vpack.c.bf16 %v2167_v1, %v2167_v1 }
 0xfff   :  { %3498 = vmatprep.subr.bf16.mxu1 %v3686_v4 }
0x1003   :  { %3487 = vmatmul.mubr.msk.bf16.vlgmr.msra.gmra.mrb[88].mxu1 %vm257_vm2, %v2176_v3 }
0x1004   :  { %3481 = vmatmul.mubr.msk.bf16.vlgmr.msra.gmra.mrb[52].mxu0 %vm257_vm2, %v2175_v5  ;;  %3506 = vmatprep.mubr.msk.bf16.mxu1 %vm3687_vm1, %v3686_v4 }
0x1005   :  { %3494 = vmatprep.mubr.msk.bf16.mxu0 %vm3687_vm1, %v3686_v4 }
0x1006   :  { %3491 = vmatpush3.bf16.xpose.msra.mxu0 %v2619_v11  ;;  %v3588_v11 = vld [vmem:[%s4530_s10 + $0x20] sm:$0xff]  }
0x1007   :  { %3492 = vmatprep.subr.bf16.mxu0 %v3686_v4 }
0x100e   :  { %3493 = vmatpush3.bf16.xpose.msra.mxu0 %v2622_v24  ;;  %v3591_v24 = vld [vmem:[%s4530_s10 + $0x38] sm:$0xff]  }
0x100f   :  { %3510 = vmatprep.subr.bf16.mxu0 %v3686_v4 }
0x103c   :  { %v2219_v46 = vpop.f32.mrb[40].mxu0 }
0x103d   :  { %v3446_v6 = vpop.f32.mrb[41].mxu0 }
0x103e   :  { %v2222_v8 = vpop.f32.mrb[42].mxu0 }
0x103f   :  { %v3447_v9 = vpop.f32.mrb[43].mxu0 }
0x1089   :  { %v2267_v55 = vpop.f32.mrb[76].mxu1 }
0x108a   :  { %v3452_v42 = vpop.f32.mrb[77].mxu1 }
0x108b   :  { %v2270_v15 = vpop.f32.mrb[78].mxu1 }
0x108c   :  { %v3453_v16 = vpop.f32.mrb[79].mxu1 }
0x1099   :  { %v2363_v18 = vpop.f32.mrb[80].mxu1 }
0x109a   :  { %v2315_v62 = vpop.f32.mrb[44].mxu0  ;;  %v3464_v54 = vpop.f32.mrb[81].mxu1 }
0x109b   :  { %v3458_v19 = vpop.f32.mrb[45].mxu0  ;;  %v2366_v20 = vpop.f32.mrb[82].mxu1 }
0x109c   :  { %v2318_v13 = vpop.f32.mrb[46].mxu0  ;;  %v3465_v14 = vpop.f32.mrb[83].mxu1 }
0x109d   :  { %v3459_v21 = vpop.f32.mrb[47].mxu0  ;;  %v3589_v13 = vld [vmem:[%s4530_s10 + $0x28] sm:$0xff]  }
0x109e   :  { %v2758_v14 = vsel %vm66_vm0, %v3589_v13, 0  ;;  %v3590_v21 = vld [vmem:[%s4530_s10 + $0x30] sm:$0xff]  }
0x109f   :  { %v2761_v23 = vsel %vm66_vm0, %v3590_v21, 0 }
0x10ce   :  { %v2459_v25 = vpop.f32.mrb[84].mxu1 }
0x10cf   :  { %v2411_v2 = vpop.f32.mrb[48].mxu0  ;;  %v3550_v26 = vpack.i.bf16 %v2459_v25, %v2267_v55  ;;  %v3476_v27 = vpop.f32.mrb[85].mxu1  ;;  %v2755_v55 = vsel %vm66_vm0, %v3588_v11, 0  ;;  %v2764_v25 = vsel %vm66_vm0, %v3591_v24, 0 }
0x10d0   :  { %v3470_v22 = vpop.f32.mrb[49].mxu0  ;;  %v2462_v29 = vpop.f32.mrb[86].mxu1  ;;  %3499 = vmatpush3.bf16.xpose.msra.mxu1 %v2755_v55 }
0x10d1   :  { %v2414_v30 = vpop.f32.mrb[50].mxu0  ;;  %3551 = vrot.lane.b32.xlu1 %v3550_v26, %s3694_s25  ;;  %v3477_v51 = vpop.f32.mrb[87].mxu1  ;;  %3500 = vmatprep.subr.bf16.mxu1 %v3686_v4 }
0x10d2   :  { %v3471_v31 = vpop.f32.mrb[51].mxu0 }
0x10d6   :  { %v2555_v32 = vpop.f32.mrb[88].mxu1 }
0x10d7   :  { %v2507_v33 = vpop.f32.mrb[52].mxu0  ;;  %v3560_v28 = vpack.i.bf16 %v2555_v32, %v2363_v18  ;;  %v3488_v17 = vpop.f32.mrb[89].mxu1  ;;  %v3105_v32 = vld [vmem:[%s4531_s8 + $0x1] ss:$0 sm:$0xff] }
0x10d8   :  { %v3555_v59 = vpack.i.bf16 %v2507_v33, %v2315_v62  ;;  %v3482_v34 = vpop.f32.mrb[53].mxu0  ;;  %v2558_v36 = vpop.f32.mrb[90].mxu1  ;;  %3501 = vmatpush3.bf16.xpose.msra.mxu1 %v2758_v14 }
0x10d9   :  { %v2510_v37 = vpop.f32.mrb[54].mxu0  ;;  %3561 = vrot.lane.b32.xlu1 %v3560_v28, %s3695_s3  ;;  %v3489_v38 = vpop.f32.mrb[91].mxu1  ;;  %3502 = vmatprep.subr.bf16.mxu1 %v3686_v4 }
0x10da   :  { %3556 = vrot.lane.b32.xlu0 %v3555_v59, %s3693_s22  ;;  %v3483_v39 = vpop.f32.mrb[55].mxu0  ;;  %v3106_v59 = vld [vmem:[%s4532_s9 + $0x1] ss:$0 sm:$0xff] }
0x10db   :  { %v3592_v39 = vld [vmem:[%s4533_s12 + $0x10] sm:$0xff]  }
0x10e0   :  { %3503 = vmatpush3.bf16.xpose.msra.mxu1 %v2761_v23 }
0x10e1   :  { %3504 = vmatprep.subr.bf16.mxu1 %v3686_v4 }
0x10e8   :  { %3505 = vmatpush3.bf16.xpose.msra.mxu1 %v2764_v25 }
0x1143   :  { %v3552_v40 = vpop.permute.xlu1 %3551 }
0x1144   :  { %v3554_v7 = vunpack.i.h.bf16 %v3552_v40  ;;  %v3553_v43 = vunpack.i.l.bf16 %v3552_v40  ;;  %v2853_v40 = vsel %vm1434_vm6, %v3592_v39, 0 }
0x1146   :  { %v2573_v47 = vsel %vm257_vm2, %v2219_v46, %v3553_v43  ;;  %v2588_v41 = vsel %vm257_vm2, %v2411_v2, %v3554_v7  ;;  %v3593_v7 = vld [vmem:[%s4533_s12 + $0x18] sm:$0xff]  }
0x1147   :  { %v2856_v43 = vsel %vm1434_vm6, %v3593_v7, 0 }
0x114b   :  { %v3562_v12 = vpop.permute.xlu1 %3561 }
0x114c   :  { %v3564_v35 = vunpack.i.h.bf16 %v3562_v12  ;;  %v3563_v63 = vunpack.i.l.bf16 %v3562_v12  ;;  %v3557_v44 = vpop.permute.xlu0 %3556  ;;  %v3116_v12 = vld [vmem:[%s4534_s11 + $0x1] ss:$0 sm:$0xff] }
0x114d   :  { %v3559_v45 = vunpack.i.h.bf16 %v3557_v44  ;;  %v3558_v58 = vunpack.i.l.bf16 %v3557_v44 }
0x114f   :  { %v2589_v49 = vsel %vm1165_vm4, %v2588_v41, %v3559_v45  ;;  %v2574_v50 = vsel %vm1165_vm4, %v2573_v47, %v3558_v58 }
0x1150   :  { %v2590_v52 = vsel %vm1167_vm5, %v2589_v49, %v3564_v35  ;;  %v2575_v53 = vsel %vm1167_vm5, %v2574_v50, %v3563_v63 }
0x1151   :  { %v2598_v56 = vpack.c.bf16 %v2590_v52, %v2575_v53 }
0x1153   :  { %3495 = vmatmul.mubr.msk.bf16.vlgmr.msra.gmra.mrb[56].mxu0 %vm66_vm0, %v2598_v56 }
0x1154   :  { %3514 = vmatprep.mubr.msk.bf16.mxu0 %vm3687_vm1, %v3686_v4  ;;  %3511 = vmatpush3.bf16.xpose.msra.mxu0 %v2853_v40  ;;  %v3134_v40 = vld [vmem:[%s4537_s15 + $0x1] ss:$0 sm:$0xff] }
0x1155   :  { %3512 = vmatprep.subr.bf16.mxu0 %v3686_v4 }
0x115c   :  { %3513 = vmatpush3.bf16.xpose.msra.mxu0 %v2856_v43 }
0x115d   :  { %3518 = vmatprep.subr.bf16.mxu0 %v3686_v4 }
0x1226   :  { %v2658_v61 = vpop.f32.mrb[56].mxu0 }
0x1227   :  { %v2659_v0 = vadd.f32 %v3099_v48, %v2658_v61  ;;  %v3496_v1 = vpop.f32.mrb[57].mxu0 }
0x1228   :  { %v2661_v3 = vpop.f32.mrb[58].mxu0 }
0x1229   :  { %v2662_v5 = vadd.f32 %v3099_v48, %v2661_v3  ;;  %v3497_v46 = vpop.f32.mrb[59].mxu0  ;;  %v2665_v6 = vadd.f32 %v2659_v0, %v4209_v57 }
0x122b   :  { %v2671_v8 = vsel %vm66_vm0, %v2665_v6, 0.0  ;;  %v2666_v9 = vadd.f32 %v2662_v5, %v4211_v60 }
0x122c   :  { %2672 = vadd.xlane.f32.xlu0 %v2671_v8 }
0x122d   :  { %v2674_v10 = vsel %vm66_vm0, %v2666_v9, 0.0 }
0x122e   :  { %2675 = vadd.xlane.f32.xlu1 %v2674_v10 }
0x12b9   :  { %v2673_v42 = vpop.xlane.xlu0 %2672 }
0x12ba   :  { %v2677_v15 = vmul.f32 0.03125, %v2673_v42  ;;  %v3127_v42 = vld [vmem:[%s4535_s13 + $0x1] ss:$0 sm:$0xff] }
0x12bb   :  { %v2676_v57 = vpop.xlane.xlu1 %2675 }
0x12bc   :  { %v2679_v16 = vsub.f32 %v2665_v6, %v2677_v15  ;;  %v2678_v18 = vmul.f32 0.03125, %v2676_v57 }
0x12be   :  { %v2680_v62 = vsub.f32 %v2666_v9, %v2678_v18  ;;  %v2681_v60 = vmul.f32 %v2679_v16, %v2679_v16 }
0x12c0   :  { %v2683_v54 = vsel %vm66_vm0, %v2681_v60, 0.0  ;;  %v2682_v19 = vmul.f32 %v2680_v62, %v2680_v62 }
0x12c1   :  { %2684 = vadd.xlane.f32.xlu0 %v2683_v54 }
0x12c2   :  { %v2686_v20 = vsel %vm66_vm0, %v2682_v19, 0.0 }
0x12c5   :  { %2687 = vadd.xlane.f32.xlu0 %v2686_v20 }
0x134e   :  { %v2685_v2 = vpop.xlane.xlu0 %2684 }
0x134f   :  { %v2689_v26 = vmul.f32 0.03125, %v2685_v2 }
0x1351   :  { %v2691_v27 = vadd.f32 1e-12, %v2689_v26 }
0x1352   :  { %v2688_v22 = vpop.xlane.xlu0 %2687 }
0x1353   :  { %3674 = vrsqrt.f32 %v2691_v27  ;;  %v2690_v29 = vmul.f32 0.03125, %v2688_v22 }
0x1355   :  { %v2692_v30 = vadd.f32 1e-12, %v2690_v29  ;;  %v3696_v29 = vmov 0  }
0x1356   :  { %3565 = vset.pattern.permute.xlu0 %v3696_v29 }
0x1357   :  { %3676 = vrsqrt.f32 %v2692_v30  ;;  %v2949_v30 = vld [vmem:[%s4538_s17] sm:$0x3] }
0x135d   :  { %v3675_v51 = vpop.eup %3674 }
0x135e   :  { %v2695_v31 = vmul.f32 %v3675_v51, %v2679_v16 }
0x1360   :  { %v2703_v28 = vmul.f32 %v3105_v32, %v2695_v31 }
0x1361   :  { %v3677_v33 = vpop.eup %3676 }
0x1362   :  { %v2696_v17 = vmul.f32 %v3677_v33, %v2680_v62  ;;  %v2711_v36 = vadd.f32 %v3106_v59, %v2703_v28 }
0x1364   :  { %v2704_v34 = vmul.f32 %v3105_v32, %v2696_v17 }
0x1366   :  { %v2712_v37 = vadd.f32 %v3106_v59, %v2704_v34  ;;  %v3133_v34 = vld [vmem:[%s4536_s14 + $0x1] ss:$0 sm:$0xff] }
0x1368   :  { %v2724_v38 = vpack.c.bf16 %v2712_v37, %v2711_v36 }
0x136a   :  { %3507 = vmatmul.mubr.msk.bf16.vlgmr.msra.gmra.mrb[92].mxu1 %vm66_vm0, %v2724_v38 }
0x143d   :  { %v2800_v35 = vpop.f32.mrb[92].mxu1 }
0x143e   :  { %v2801_v63 = vadd.f32 %v3116_v12, %v2800_v35  ;;  %v3508_v44 = vpop.f32.mrb[93].mxu1 }
0x143f   :  { %v2803_v45 = vpop.f32.mrb[94].mxu1  ;;  %v2947_v44 = vld [vmem:[%s4539_s16] sm:$0x1] }
0x1440   :  { %v2809_v58 = vmul.f32 0.044715, %v2801_v63  ;;  %v2804_v47 = vadd.f32 %v3116_v12, %v2803_v45  ;;  %v3509_v41 = vpop.f32.mrb[95].mxu1  ;;  %v2807_v6 = vmul.f32 0.5, %v2801_v63 }
0x1442   :  { %v2811_v49 = vmul.f32 %v2809_v58, %v2801_v63  ;;  %v2810_v50 = vmul.f32 0.044715, %v2804_v47  ;;  %v2808_v8 = vmul.f32 0.5, %v2804_v47 }
0x1444   :  { %v2813_v52 = vmul.f32 %v2811_v49, %v2801_v63  ;;  %v2812_v53 = vmul.f32 %v2810_v50, %v2804_v47 }
0x1446   :  { %v2815_v56 = vadd.f32 %v2813_v52, %v2801_v63  ;;  %v2814_v48 = vmul.f32 %v2812_v53, %v2804_v47 }
0x1448   :  { %v2817_v61 = vmul.f32 0.7978846, %v2815_v56  ;;  %v2816_v0 = vadd.f32 %v2814_v48, %v2804_v47 }
0x144a   :  { %3678 = vtanh.f32 %v2817_v61  ;;  %v2818_v1 = vmul.f32 0.7978846, %v2816_v0 }
0x144c   :  { %3680 = vtanh.f32 %v2818_v1 }
0x1454   :  { %v3679_v3 = vpop.eup %3678 }
0x1455   :  { %v2821_v5 = vadd.f32 1.0, %v3679_v3 }
0x1456   :  { %v3681_v46 = vpop.eup %3680 }
0x1457   :  { %v2822_v9 = vadd.f32 1.0, %v3681_v46  ;;  %v2823_v10 = vmul.f32 %v2821_v5, %v2807_v6 }
0x1459   :  { %v2824_v11 = vmul.f32 %v2822_v9, %v2808_v8 }
0x145b   :  { %v2832_v55 = vpack.c.bf16 %v2824_v11, %v2823_v10 }
0x145d   :  { %3515 = vmatmul.mubr.msk.bf16.vlgmr.msra.gmra.mrb[60].mxu0 %vm1434_vm6, %v2832_v55 }
0x145e   :  { %3520 = vmatprep.mubr.msk.bf16.mxu0 %vm3687_vm1, %v3686_v4 }
0x1530   :  { %v2892_v15 = vpop.f32.mrb[60].mxu0 }
0x1531   :  { %v2893_v57 = vadd.f32 %v3127_v42, %v2892_v15  ;;  %v3516_v16 = vpop.f32.mrb[61].mxu0 }
0x1532   :  { %v2895_v18 = vpop.f32.mrb[62].mxu0 }
0x1533   :  { %v2899_v62 = vadd.f32 %v2893_v57, %v2711_v36  ;;  %v2896_v60 = vadd.f32 %v3127_v42, %v2895_v18  ;;  %v3517_v54 = vpop.f32.mrb[63].mxu0 }
0x1535   :  { %v2900_v19 = vadd.f32 %v2896_v60, %v2712_v37  ;;  %v2905_v20 = vsel %vm66_vm0, %v2899_v62, 0.0 }
0x1536   :  { %2906 = vadd.xlane.f32.xlu0 %v2905_v20 }
0x1537   :  { %v2908_v13 = vsel %vm66_vm0, %v2900_v19, 0.0 }
0x1538   :  { %2909 = vadd.xlane.f32.xlu1 %v2908_v13 }
0x15c3   :  { %v2907_v14 = vpop.xlane.xlu0 %2906 }
0x15c4   :  { %v2911_v4 = vmul.f32 0.03125, %v2907_v14 }
0x15c5   :  { %v2910_v21 = vpop.xlane.xlu1 %2909 }
0x15c6   :  { %v2913_v23 = vsub.f32 %v2899_v62, %v2911_v4  ;;  %v2912_v24 = vmul.f32 0.03125, %v2910_v21 }
0x15c8   :  { %v2914_v25 = vsub.f32 %v2900_v19, %v2912_v24  ;;  %v2915_v2 = vmul.f32 %v2913_v23, %v2913_v23 }
0x15ca   :  { %v2917_v26 = vsel %vm66_vm0, %v2915_v2, 0.0  ;;  %v2916_v27 = vmul.f32 %v2914_v25, %v2914_v25 }
0x15cb   :  { %2918 = vadd.xlane.f32.xlu0 %v2917_v26 }
0x15cc   :  { %v2920_v22 = vsel %vm66_vm0, %v2916_v27, 0.0 }
0x15cd   :  { %2921 = vadd.xlane.f32.xlu1 %v2920_v22 }
0x15e1   :  { %2952 = vperm.xlu0 %3565, %v2949_v30  }
0x1658   :  { %v2919_v51 = vpop.xlane.xlu0 %2918 }
0x1659   :  { %v2923_v31 = vmul.f32 0.03125, %v2919_v51 }
0x165a   :  { %v2922_v32 = vpop.xlane.xlu1 %2921 }
0x165b   :  { %v2925_v33 = vadd.f32 1e-12, %v2923_v31  ;;  %v2924_v28 = vmul.f32 0.03125, %v2922_v32 }
0x165d   :  { %3682 = vrsqrt.f32 %v2925_v33  ;;  %v2926_v17 = vadd.f32 1e-12, %v2924_v28 }
0x165f   :  { %3684 = vrsqrt.f32 %v2926_v17 }
0x1660   :  { %v2953_v45 = vpop.permute.xlu0 %2952 }
0x1667   :  { %v3683_v59 = vpop.eup %3682 }
0x1668   :  { %v2929_v36 = vmul.f32 %v3683_v59, %v2913_v23 }
0x1669   :  { %v3685_v37 = vpop.eup %3684 }
0x166a   :  { %v2930_v38 = vmul.f32 %v3685_v37, %v2914_v25  ;;  %v2937_v39 = vmul.f32 %v3133_v34, %v2929_v36 }
0x166c   :  { %v2938_v7 = vmul.f32 %v3133_v34, %v2930_v38  ;;  %v2945_v43 = vadd.f32 %v3134_v40, %v2937_v39 }
0x166e   :  { %v2946_v12 = vadd.f32 %v3134_v40, %v2938_v7 }
0x1670   :  { %v2948_v35 = vpack.c.bf16 %v2946_v12, %v2945_v43 }
0x1672   :  { %v2959_v63 = vsel %vm66_vm0, %v2948_v35, 0 }
0x1673   :  { %3519 = vmatpush3.bf16.xpose.msra.mxu0 %v2959_v63 }
0x167a   :  { %3521 = vmatmul.mubr.msk.bf16.vlgmr.msra.gmra.mrb[64].mxu0 %vm66_vm0, %v2947_v44 }
0x174d   :  { %v2995_v58 = vpop.f32.mrb[64].mxu0 }
0x174e   :  { %v2996_v47 = vadd.f32 %v2995_v58, %v2953_v45  ;;  %v3522_v41 = vpop.f32.mrb[65].mxu0 }
0x174f   :  { %v2998_v49 = vpop.f32.mrb[66].mxu0 }
0x1750   :  { %3002 = vst.msk [vmem:[%s4540_s18] sm:$0x1] %vm3001_vm7, %v2996_v47  ;;  %v3523_v50 = vpop.f32.mrb[67].mxu0 }
0x1751   :  { %3004 = vst.msk [vmem:[%s4541_s19 - $0x1] sm:$0x2] %vm3003_vm8, %v2996_v47 }

</bundles_post_ra>
